<compile_context>
chip_gen: v7x
topology: tpu7x:2x2x1
jax: 0.10.0
libtpu: 0.0.40
codegen_flags: <defaults>
</compile_context>

<pallas_src>
import jax
import jax.numpy as jnp
import numpy as np
from jax import lax
from jax.experimental import pallas as pl
from jax.experimental.pallas import tpu as pltpu

BN_EPS = 1e-5
LANE = 128                       # TPU lane width; output-channel axis padded to a multiple
TM_MM = 256                      # row tile for the conv matmul (keeps >=2 tiles on v7x)
TM_EW = 512                      # row tile for the memory-bound elementwise passes
ROW_ALIGN = 512                  # lcm(TM_MM, TM_EW): all row counts padded to this
VMEM_LIMIT = 32 * 1024 * 1024    # fits the scoped budget on v5e/v6e/v7x


def _round_up(x, m):
    return (x + m - 1) // m * m


# ----------------------------- Pallas kernels ------------------------------

def conv_mm_stats_kernel(a_ref, w_ref, y_ref, stat_ref):
    """y = a @ w (bf16 x bf16 -> f32 acc), full-K, W VMEM-resident.

    Per-row-tile sum / sum-of-squares are emitted from the f32 accumulator
    (before the bf16 cast) so BN batch statistics need no extra HBM pass."""
    acc = jnp.dot(a_ref[...], w_ref[...], preferred_element_type=jnp.float32)
    y_ref[...] = acc.astype(y_ref.dtype)
    s = jnp.sum(acc, axis=0, keepdims=True)            # (1, Cpad)
    ss = jnp.sum(acc * acc, axis=0, keepdims=True)     # (1, Cpad)
    stat_ref[...] = jnp.concatenate([s, ss], axis=0)   # (2, Cpad)


def mm_kernel(a_ref, w_ref, y_ref):
    """Stats-free matmul for the 1x1 shortcut (no wasted sum/sumsq work)."""
    y_ref[...] = jnp.dot(a_ref[...], w_ref[...],
                         preferred_element_type=jnp.float32).astype(y_ref.dtype)


def scale_shift_relu_kernel(y_ref, scale_ref, shift_ref, o_ref):
    # BN folded into per-channel scale/shift (from fused stats) + ReLU.
    out = y_ref[...].astype(jnp.float32) * scale_ref[...] + shift_ref[...]
    o_ref[...] = jnp.maximum(out, 0.0).astype(o_ref.dtype)


def scale_shift_add_relu_kernel(y_ref, scale_ref, shift_ref, res_ref, o_ref):
    # BN (folded) + residual add + ReLU; residual is a bf16 row tile.
    out = (y_ref[...].astype(jnp.float32) * scale_ref[...] + shift_ref[...]
           + res_ref[...].astype(jnp.float32))
    o_ref[...] = jnp.maximum(out, 0.0).astype(o_ref.dtype)


# ----------------------------- Pallas wrappers ------------------------------

def pallas_conv_mm(a_bf16, w_bf16, *, with_stats, out_dtype=jnp.bfloat16):
    """a: (Mpad, K) bf16, w: (K, Cpad) bf16.  Full-K blocks, W resident.

    Returns y (Mpad, Cpad) in `out_dtype`, plus per-row-tile (m_tiles, 2, Cpad)
    f32 [sum; sumsq] when with_stats."""
    Mpad, K = a_bf16.shape
    Cpad = w_bf16.shape[1]
    m_tiles = Mpad // TM_MM

    a_spec = pl.BlockSpec((TM_MM, K), lambda i: (i, 0))
    w_spec = pl.BlockSpec((K, Cpad), lambda i: (0, 0))       # constant -> fetched once
    y_spec = pl.BlockSpec((TM_MM, Cpad), lambda i: (i, 0))
    cp = pltpu.CompilerParams(dimension_semantics=("parallel",),
                              vmem_limit_bytes=VMEM_LIMIT)

    if with_stats:
        return pl.pallas_call(
            conv_mm_stats_kernel,
            out_shape=(jax.ShapeDtypeStruct((Mpad, Cpad), out_dtype),
                       jax.ShapeDtypeStruct((m_tiles, 2, Cpad), jnp.float32)),
            grid_spec=pltpu.PrefetchScalarGridSpec(
                num_scalar_prefetch=0,
                grid=(m_tiles,),
                in_specs=[a_spec, w_spec],
                out_specs=[y_spec,
                           pl.BlockSpec((None, 2, Cpad), lambda i: (i, 0, 0))]),
            compiler_params=cp,
        )(a_bf16, w_bf16)

    return pl.pallas_call(
        mm_kernel,
        out_shape=jax.ShapeDtypeStruct((Mpad, Cpad), out_dtype),
        grid=(m_tiles,),
        in_specs=[a_spec, w_spec],
        out_specs=y_spec,
        compiler_params=cp,
    )(a_bf16, w_bf16)


def pallas_scale_shift_act(y, scale, shift, residual=None, out_dtype=jnp.float32):
    """(Mpad, Cpad): out = relu(y * scale + shift [+ residual]); 512-row tiles."""
    Mpad, Cpad = y.shape
    m_tiles = Mpad // TM_EW
    mat = pl.BlockSpec((TM_EW, Cpad), lambda i: (i, 0))
    vec = pl.BlockSpec((1, Cpad), lambda i: (0, 0))
    cp = pltpu.CompilerParams(dimension_semantics=("parallel",),
                              vmem_limit_bytes=VMEM_LIMIT)
    if residual is None:
        return pl.pallas_call(
            scale_shift_relu_kernel,
            out_shape=jax.ShapeDtypeStruct((Mpad, Cpad), out_dtype),
            grid=(m_tiles,),
            in_specs=[mat, vec, vec],
            out_specs=mat,
            compiler_params=cp,
        )(y, scale, shift)
    return pl.pallas_call(
        scale_shift_add_relu_kernel,
        out_shape=jax.ShapeDtypeStruct((Mpad, Cpad), out_dtype),
        grid=(m_tiles,),
        in_specs=[mat, vec, vec, mat],
        out_specs=mat,
        compiler_params=cp,
    )(y, scale, shift, residual)


# ------------------------------ JAX glue ------------------------------------

def im2col(x_nhwc, ksize, stride, pad):
    """KxK patches -> bf16 (N*Hout*Wout, K*K*Cin); tap-major then channel.

    NOTE: channels are NOT lane-padded here — K stays at the real 9*Cin."""
    N, H, W, C = x_nhwc.shape
    xp = jnp.pad(x_nhwc, ((0, 0), (pad, pad), (pad, pad), (0, 0)))
    xp = xp.astype(jnp.bfloat16)
    Hout = (H + 2 * pad - ksize) // stride + 1
    Wout = (W + 2 * pad - ksize) // stride + 1
    cols = []
    for dy in range(ksize):
        for dx in range(ksize):
            cols.append(xp[:, dy:dy + (Hout - 1) * stride + 1:stride,
                              dx:dx + (Wout - 1) * stride + 1:stride, :])
    patches = jnp.concatenate(cols, axis=-1)
    return patches.reshape(N * Hout * Wout, ksize * ksize * C), Hout, Wout


def conv_weight_to_mat(w_oihw, cout_pad):
    """(O, I, kH, kW) -> bf16 (kH*kW*I, cout_pad); only the OUTPUT axis is padded."""
    O, I, KH, KW = w_oihw.shape
    wp = jnp.pad(w_oihw, ((0, cout_pad - O), (0, 0), (0, 0), (0, 0)))
    return (jnp.transpose(wp, (2, 3, 1, 0))
            .reshape(KH * KW * I, cout_pad).astype(jnp.bfloat16))


def bn_affine(stats, m_true, gamma, beta, cpad):
    """Reduce per-tile partial stats and fold BN into per-channel scale/shift."""
    s = jnp.sum(stats[:, 0, :], axis=0)
    ss = jnp.sum(stats[:, 1, :], axis=0)
    mean = s / m_true
    var = jnp.maximum(ss / m_true - mean * mean, 0.0)
    g = jnp.pad(gamma, (0, cpad - gamma.shape[0]))
    b = jnp.pad(beta, (0, cpad - beta.shape[0]))
    scale = g * lax.rsqrt(var + BN_EPS)
    shift = b - mean * scale
    return scale.reshape(1, cpad), shift.reshape(1, cpad)


def pad_rows(a, mpad):
    return a if a.shape[0] == mpad else jnp.pad(a, ((0, mpad - a.shape[0]), (0, 0)))


def residual_block_forward(x_nchw, params, use_1x1conv, stride):
    N, Cin, H, W = x_nchw.shape
    Cout = params["w1"].shape[0]
    if not use_1x1conv:
        assert stride == 1 and Cin == Cout, (
            "identity shortcut requires stride == 1 and inchannels == outchannels")
    Cpad = _round_up(Cout, LANE)       # lane pad on the output-channel axis only

    x = jnp.transpose(x_nchw, (0, 2, 3, 1)).astype(jnp.bfloat16)   # NHWC, bf16

    # conv1 (3x3, stride s, pad 1) fused with BN1 batch stats; b1 dropped
    # (a per-channel bias before training-mode BN is cancelled by the mean).
    p1, H1, W1 = im2col(x, 3, stride, 1)
    M1 = N * H1 * W1
    Mpad = _round_up(M1, ROW_ALIGN)
    p1 = pad_rows(p1, Mpad)
    y1, st1 = pallas_conv_mm(p1, conv_weight_to_mat(params["w1"], Cpad),
                             with_stats=True)                     # bf16 (Mpad, Cpad)
    scale1, shift1 = bn_affine(st1, M1, params["g1"], params["be1"], Cpad)
    y1 = pallas_scale_shift_act(y1, scale1, shift1, out_dtype=jnp.bfloat16)

    # conv2 (3x3, stride 1, pad 1) fused with BN2 batch stats; b2 dropped
    y1_img = y1[:M1, :Cout].reshape(N, H1, W1, Cout)              # bf16, real channels
    p2, _, _ = im2col(y1_img, 3, 1, 1)
    p2 = pad_rows(p2, Mpad)
    y2, st2 = pallas_conv_mm(p2, conv_weight_to_mat(params["w2"], Cpad),
                             with_stats=True)                     # bf16 (Mpad, Cpad)
    scale2, shift2 = bn_affine(st2, M1, params["g2"], params["be2"], Cpad)

    # shortcut (bf16 residual stream either way)
    if use_1x1conv:
        xs = x[:, ::stride, ::stride, :].reshape(M1, Cin)          # (M1, Cin) bf16
        xs = pad_rows(xs, Mpad)
        sc = pallas_conv_mm(xs, conv_weight_to_mat(params["w3"], Cpad),
                            with_stats=False)                      # bf16, no stats
        # no BN after the 1x1 conv -> fold its bias into the fused per-channel shift
        shift2 = shift2 + jnp.pad(params["b3"], (0, Cpad - Cout)).reshape(1, Cpad)
    else:
        sc = pad_rows(jnp.pad(x.reshape(M1, Cin), ((0, 0), (0, Cpad - Cin))), Mpad)

    out = pallas_scale_shift_act(y2, scale2, shift2, residual=sc,
                                 out_dtype=jnp.float32)
    out = out[:M1, :Cout].reshape(N, H1, W1, Cout)
    return jnp.transpose(out, (0, 3, 1, 2))                        # NCHW


# ------------------------- reference (plain JAX) ----------------------------

def ref_forward(x, params, use_1x1conv, stride):
    def conv(x, w, b, s, pad):
        y = lax.conv_general_dilated(
            x, w, (s, s), [(pad, pad), (pad, pad)],
            dimension_numbers=("NCHW", "OIHW", "NCHW"))
        return y + b[None, :, None, None]

    def bn(y, g, be):
        mean = y.mean(axis=(0, 2, 3), keepdims=True)
        var = ((y - mean) ** 2).mean(axis=(0, 2, 3), keepdims=True)
        return (g[None, :, None, None] * (y - mean) / jnp.sqrt(var + BN_EPS)
                + be[None, :, None, None])

    y = jax.nn.relu(bn(conv(x, params["w1"], params["b1"], stride, 1),
                       params["g1"], params["be1"]))
    y = bn(conv(y, params["w2"], params["b2"], 1, 1), params["g2"], params["be2"])
    if use_1x1conv:
        x = conv(x, params["w3"], params["b3"], stride, 0)
    return jax.nn.relu(x + y)


# ------------------------------ params --------------------------------------

def make_params(key, cin, cout, use_1x1conv):
    ks = jax.random.split(key, 6)
    params = dict(
        w1=jax.random.normal(ks[0], (cout, cin, 3, 3), jnp.float32) * 0.1,
        b1=jax.random.normal(ks[1], (cout,), jnp.float32) * 0.05,
        w2=jax.random.normal(ks[2], (cout, cout, 3, 3), jnp.float32) * 0.1,
        b2=jax.random.normal(ks[3], (cout,), jnp.float32) * 0.05,
        g1=jnp.ones((cout,), jnp.float32), be1=jnp.zeros((cout,), jnp.float32),
        g2=jnp.ones((cout,), jnp.float32), be2=jnp.zeros((cout,), jnp.float32),
    )
    if use_1x1conv:
        params["w3"] = jax.random.normal(ks[4], (cout, cin, 1, 1), jnp.float32) * 0.1
        params["b3"] = jax.random.normal(ks[5], (cout,), jnp.float32) * 0.05
    return params


if __name__ == "__main__":
    key = jax.random.PRNGKey(0)
    kx, kp1, kp2 = jax.random.split(key, 3)
    x = jax.random.normal(kx, (2, 4, 16, 16), jnp.float32)  # NCHW

    fwd = jax.jit(residual_block_forward, static_argnums=(2, 3))

    # bf16 MXU operands + bf16 intermediates -> compare against the f32
    # reference at a bf16-level tolerance.
    TOL = dict(rtol=3e-2, atol=3e-2)

    # Case 1: identity shortcut (inchannels == outchannels == 4, stride 1)
    params1 = make_params(kp1, 4, 4, use_1x1conv=False)
    out1 = jax.block_until_ready(fwd(x, params1, False, 1))
    ref1 = ref_forward(x, params1, False, 1)
    np.testing.assert_allclose(np.asarray(out1), np.asarray(ref1), **TOL)

    # Case 2: 1x1-conv shortcut, stride 2, channels 4 -> 8
    params2 = make_params(kp2, 4, 8, use_1x1conv=True)
    out2 = jax.block_until_ready(fwd(x, params2, True, 2))
    ref2 = ref_forward(x, params2, True, 2)
    np.testing.assert_allclose(np.asarray(out2), np.asarray(ref2), **TOL)

    print("KERNEL_OK")
</pallas_src>

<mosaic_0001>
module attributes {stable_mosaic.version = 11 : i64} {
  func.func @conv_mm_stats_kernel(%arg0: i32, %arg1: memref<256x36xbf16, #tpu.memory_space<vmem>>, %arg2: memref<36x128xbf16, #tpu.memory_space<vmem>>, %arg3: memref<256x128xbf16, #tpu.memory_space<vmem>>, %arg4: memref<1x2x128xf32, #tpu.memory_space<vmem>>) attributes {dimension_semantics = [#tpu.dimension_semantics<parallel>], iteration_bounds = array<i64: 2>, scalar_prefetch = 0 : i64, scratch_operands = 0 : i64, tpu.core_type = #tpu.core_type<tc>, window_params = [{transform_indices = @transform_0, window_bounds = array<i64: 256, 36>}, {pipeline_mode = #tpu.pipeline_mode<synchronous>, transform_indices = @transform_1, window_bounds = array<i64: 36, 128>}, {transform_indices = @transform_2, window_bounds = array<i64: 256, 128>}, {transform_indices = @transform_3, window_bounds = array<i64: 1, 2, 128>}]} {
    %c0 = arith.constant 0 : index
    %c0_0 = arith.constant 0 : index
    %0 = vector.load %arg1[%c0, %c0_0] : memref<256x36xbf16, #tpu.memory_space<vmem>>, vector<256x36xbf16>
    %c0_1 = arith.constant 0 : index
    %c0_2 = arith.constant 0 : index
    %1 = vector.load %arg2[%c0_1, %c0_2] : memref<36x128xbf16, #tpu.memory_space<vmem>>, vector<36x128xbf16>
    %cst = arith.constant dense<0.000000e+00> : vector<256x128xf32>
    %2 = tpu.matmul %0, %1, %cst {dimension_numbers = #tpu.dot_dimension_numbers<[1], [0], [0], [1], [0, 0, 1, 1], [], []>} : vector<256x36xbf16>, vector<36x128xbf16>, vector<256x128xf32> -> vector<256x128xf32>
    %3 = arith.truncf %2 : vector<256x128xf32> to vector<256x128xbf16>
    %c0_3 = arith.constant 0 : index
    %c0_4 = arith.constant 0 : index
    %4 = vector.load %arg3[%c0_3, %c0_4] : memref<256x128xbf16, #tpu.memory_space<vmem>>, vector<256x128xbf16>
    tpu.vector_store %arg3[%c0_3, %c0_4], %3 {strides = array<i32>} : memref<256x128xbf16, #tpu.memory_space<vmem>>, vector<256x128xbf16>,
    %cst_5 = arith.constant dense<0.000000e+00> : vector<128xf32>
    %5 = vector.multi_reduction <add>, %2, %cst_5 [0] : vector<256x128xf32> to vector<128xf32>
    %6 = vector.shape_cast %5 : vector<128xf32> to vector<1x128xf32>
    %7 = arith.mulf %2, %2 : vector<256x128xf32>
    %cst_6 = arith.constant dense<0.000000e+00> : vector<128xf32>
    %8 = vector.multi_reduction <add>, %7, %cst_6 [0] : vector<256x128xf32> to vector<128xf32>
    %9 = vector.shape_cast %8 : vector<128xf32> to vector<1x128xf32>
    %10 = tpu.concatenate %6, %9 in 0 : vector<1x128xf32>, vector<1x128xf32> -> vector<2x128xf32>
    %c0_7 = arith.constant 0 : index
    %c0_8 = arith.constant 0 : index
    %c0_9 = arith.constant 0 : index
    %11 = vector.load %arg4[%c0_7, %c0_8, %c0_9] : memref<1x2x128xf32, #tpu.memory_space<vmem>>, vector<1x2x128xf32>
    %12 = vector.shape_cast %11 : vector<1x2x128xf32> to vector<2x128xf32>
    %13 = vector.shape_cast %10 : vector<2x128xf32> to vector<1x2x128xf32>
    tpu.vector_store %arg4[%c0_7, %c0_8, %c0_9], %13 {strides = array<i32>} : memref<1x2x128xf32, #tpu.memory_space<vmem>>, vector<1x2x128xf32>,
    return
  }
  func.func @transform_0(%arg0: i32) -> (i32, i32) {
    %c0_i32 = arith.constant 0 : i32
    %c0_i32_0 = arith.constant 0 : i32
    return %arg0, %c0_i32 : i32, i32
  }
  func.func @transform_1(%arg0: i32) -> (i32, i32) {
    %c0_i32 = arith.constant 0 : i32
    %c0_i32_0 = arith.constant 0 : i32
    %c0_i32_1 = arith.constant 0 : i32
    return %c0_i32, %c0_i32_0 : i32, i32
  }
  func.func @transform_2(%arg0: i32) -> (i32, i32) {
    %c0_i32 = arith.constant 0 : i32
    %c0_i32_0 = arith.constant 0 : i32
    return %arg0, %c0_i32 : i32, i32
  }
  func.func @transform_3(%arg0: i32) -> (i32, i32, i32) {
    %c0_i32 = arith.constant 0 : i32
    %c0_i32_0 = arith.constant 0 : i32
    %c0_i32_1 = arith.constant 0 : i32
    return %arg0, %c0_i32, %c0_i32_0 : i32, i32, i32
  }
}

module attributes {stable_mosaic.version = 11 : i64} {
  func.func @scale_shift_relu_kernel(%arg0: i32, %arg1: memref<512x128xbf16, #tpu.memory_space<vmem>>, %arg2: memref<1x128xf32, #tpu.memory_space<vmem>>, %arg3: memref<1x128xf32, #tpu.memory_space<vmem>>, %arg4: memref<512x128xbf16, #tpu.memory_space<vmem>>) attributes {dimension_semantics = [#tpu.dimension_semantics<parallel>], iteration_bounds = array<i64: 1>, scalar_prefetch = 0 : i64, scratch_operands = 0 : i64, tpu.core_type = #tpu.core_type<tc>, window_params = [{transform_indices = @transform_0, window_bounds = array<i64: 512, 128>}, {pipeline_mode = #tpu.pipeline_mode<synchronous>, transform_indices = @transform_1, window_bounds = array<i64: 1, 128>}, {pipeline_mode = #tpu.pipeline_mode<synchronous>, transform_indices = @transform_2, window_bounds = array<i64: 1, 128>}, {transform_indices = @transform_3, window_bounds = array<i64: 512, 128>}]} {
    %c0 = arith.constant 0 : index
    %c0_0 = arith.constant 0 : index
    %0 = vector.load %arg1[%c0, %c0_0] : memref<512x128xbf16, #tpu.memory_space<vmem>>, vector<512x128xbf16>
    %1 = arith.extf %0 : vector<512x128xbf16> to vector<512x128xf32>
    %c0_1 = arith.constant 0 : index
    %c0_2 = arith.constant 0 : index
    %2 = vector.load %arg2[%c0_1, %c0_2] : memref<1x128xf32, #tpu.memory_space<vmem>>, vector<1x128xf32>
    %3 = vector.broadcast %2 : vector<1x128xf32> to vector<512x128xf32>
    %4 = arith.mulf %1, %3 : vector<512x128xf32>
    %c0_3 = arith.constant 0 : index
    %c0_4 = arith.constant 0 : index
    %5 = vector.load %arg3[%c0_3, %c0_4] : memref<1x128xf32, #tpu.memory_space<vmem>>, vector<1x128xf32>
    %6 = vector.broadcast %5 : vector<1x128xf32> to vector<512x128xf32>
    %7 = arith.addf %4, %6 : vector<512x128xf32>
    %cst = arith.constant 0.000000e+00 : f32
    %8 = vector.broadcast %cst : f32 to vector<512x128xf32>
    %9 = arith.maximumf %7, %8 : vector<512x128xf32>
    %10 = arith.truncf %9 : vector<512x128xf32> to vector<512x128xbf16>
    %c0_5 = arith.constant 0 : index
    %c0_6 = arith.constant 0 : index
    %11 = vector.load %arg4[%c0_5, %c0_6] : memref<512x128xbf16, #tpu.memory_space<vmem>>, vector<512x128xbf16>
    tpu.vector_store %arg4[%c0_5, %c0_6], %10 {strides = array<i32>} : memref<512x128xbf16, #tpu.memory_space<vmem>>, vector<512x128xbf16>,
    return
  }
  func.func @transform_0(%arg0: i32) -> (i32, i32) {
    %c0_i32 = arith.constant 0 : i32
    %c0_i32_0 = arith.constant 0 : i32
    return %arg0, %c0_i32 : i32, i32
  }
  func.func @transform_1(%arg0: i32) -> (i32, i32) {
    %c0_i32 = arith.constant 0 : i32
    %c0_i32_0 = arith.constant 0 : i32
    %c0_i32_1 = arith.constant 0 : i32
    return %c0_i32, %c0_i32_0 : i32, i32
  }
  func.func @transform_2(%arg0: i32) -> (i32, i32) {
    %c0_i32 = arith.constant 0 : i32
    %c0_i32_0 = arith.constant 0 : i32
    %c0_i32_1 = arith.constant 0 : i32
    return %c0_i32, %c0_i32_0 : i32, i32
  }
  func.func @transform_3(%arg0: i32) -> (i32, i32) {
    %c0_i32 = arith.constant 0 : i32
    %c0_i32_0 = arith.constant 0 : i32
    return %arg0, %c0_i32 : i32, i32
  }
}

module attributes {stable_mosaic.version = 11 : i64} {
  func.func @scale_shift_add_relu_kernel(%arg0: i32, %arg1: memref<512x128xbf16, #tpu.memory_space<vmem>>, %arg2: memref<1x128xf32, #tpu.memory_space<vmem>>, %arg3: memref<1x128xf32, #tpu.memory_space<vmem>>, %arg4: memref<512x128xbf16, #tpu.memory_space<vmem>>, %arg5: memref<512x128xf32, #tpu.memory_space<vmem>>) attributes {dimension_semantics = [#tpu.dimension_semantics<parallel>], iteration_bounds = array<i64: 1>, scalar_prefetch = 0 : i64, scratch_operands = 0 : i64, tpu.core_type = #tpu.core_type<tc>, window_params = [{transform_indices = @transform_0, window_bounds = array<i64: 512, 128>}, {pipeline_mode = #tpu.pipeline_mode<synchronous>, transform_indices = @transform_1, window_bounds = array<i64: 1, 128>}, {pipeline_mode = #tpu.pipeline_mode<synchronous>, transform_indices = @transform_2, window_bounds = array<i64: 1, 128>}, {transform_indices = @transform_3, window_bounds = array<i64: 512, 128>}, {transform_indices = @transform_4, window_bounds = array<i64: 512, 128>}]} {
    %c0 = arith.constant 0 : index
    %c0_0 = arith.constant 0 : index
    %0 = vector.load %arg1[%c0, %c0_0] : memref<512x128xbf16, #tpu.memory_space<vmem>>, vector<512x128xbf16>
    %1 = arith.extf %0 : vector<512x128xbf16> to vector<512x128xf32>
    %c0_1 = arith.constant 0 : index
    %c0_2 = arith.constant 0 : index
    %2 = vector.load %arg2[%c0_1, %c0_2] : memref<1x128xf32, #tpu.memory_space<vmem>>, vector<1x128xf32>
    %3 = vector.broadcast %2 : vector<1x128xf32> to vector<512x128xf32>
    %4 = arith.mulf %1, %3 : vector<512x128xf32>
    %c0_3 = arith.constant 0 : index
    %c0_4 = arith.constant 0 : index
    %5 = vector.load %arg3[%c0_3, %c0_4] : memref<1x128xf32, #tpu.memory_space<vmem>>, vector<1x128xf32>
    %6 = vector.broadcast %5 : vector<1x128xf32> to vector<512x128xf32>
    %7 = arith.addf %4, %6 : vector<512x128xf32>
    %c0_5 = arith.constant 0 : index
    %c0_6 = arith.constant 0 : index
    %8 = vector.load %arg4[%c0_5, %c0_6] : memref<512x128xbf16, #tpu.memory_space<vmem>>, vector<512x128xbf16>
    %9 = arith.extf %8 : vector<512x128xbf16> to vector<512x128xf32>
    %10 = arith.addf %7, %9 : vector<512x128xf32>
    %cst = arith.constant 0.000000e+00 : f32
    %11 = vector.broadcast %cst : f32 to vector<512x128xf32>
    %12 = arith.maximumf %10, %11 : vector<512x128xf32>
    %c0_7 = arith.constant 0 : index
    %c0_8 = arith.constant 0 : index
    %13 = vector.load %arg5[%c0_7, %c0_8] : memref<512x128xf32, #tpu.memory_space<vmem>>, vector<512x128xf32>
    tpu.vector_store %arg5[%c0_7, %c0_8], %12 {strides = array<i32>} : memref<512x128xf32, #tpu.memory_space<vmem>>, vector<512x128xf32>,
    return
  }
  func.func @transform_0(%arg0: i32) -> (i32, i32) {
    %c0_i32 = arith.constant 0 : i32
    %c0_i32_0 = arith.constant 0 : i32
    return %arg0, %c0_i32 : i32, i32
  }
  func.func @transform_1(%arg0: i32) -> (i32, i32) {
    %c0_i32 = arith.constant 0 : i32
    %c0_i32_0 = arith.constant 0 : i32
    %c0_i32_1 = arith.constant 0 : i32
    return %c0_i32, %c0_i32_0 : i32, i32
  }
  func.func @transform_2(%arg0: i32) -> (i32, i32) {
    %c0_i32 = arith.constant 0 : i32
    %c0_i32_0 = arith.constant 0 : i32
    %c0_i32_1 = arith.constant 0 : i32
    return %c0_i32, %c0_i32_0 : i32, i32
  }
  func.func @transform_3(%arg0: i32) -> (i32, i32) {
    %c0_i32 = arith.constant 0 : i32
    %c0_i32_0 = arith.constant 0 : i32
    return %arg0, %c0_i32 : i32, i32
  }
  func.func @transform_4(%arg0: i32) -> (i32, i32) {
    %c0_i32 = arith.constant 0 : i32
    %c0_i32_0 = arith.constant 0 : i32
    return %arg0, %c0_i32 : i32, i32
  }
}

</mosaic_0001>

<bundles_post_ra>
// kernel: residual_block_forward.4
= control target key start
LH: loop header
LB: loop body
LE: loop exit
PB: predicated region body
PF: predicated region fallthrough
CT: control target
= control target key end

     0   :  { %s1214_s12 = smov 0   ;;  %s1373_s0 = inlined_call_operand.vmem [shape: bf16[512,36], index: 0, kind: input, shape index: {}]   ;;  %s1374_s1 = inlined_call_operand.vmem [shape: bf16[36,128], index: 1, kind: input, shape index: {}]   ;;  %s1375_s2 = inlined_call_operand.vmem [shape: bf16[512,128], index: 2, kind: output, shape index: {0}]   ;;  %s1376_s3 = inlined_call_operand.vmem [shape: f32[2,2,128], index: 3, kind: output, shape index: {1}]  }
   0x1 LB: > { %s1220_s13 = sadd.s32 4294967295, %s1192_s12   ;;  %p892_p0 = scmp.ge.s32.totalorder %s1192_s12, 1  ;;  %s1192_s12 = sphi %s1214_s12, %s14_s12  }
   0x2   : > { %p141_p1 = scmp.lt.s32.totalorder %s1192_s12, 3 }
   0x4   : > { %p142_p2 = pnand %p892_p0, %p141_p1 }
   0x5   : > { %v1167_v0 = vld [vmem:[%s1374_s1] sm:$0xff] (!%p142_p2)   ;;  %v1168_v1 = vld [vmem:[%s1374_s1 + $0x8] sm:$0xff] (!%p142_p2)   ;;  %s893_s18 = sshll.u32 (!%p142_p2), %s1220_s13, 5  ;;  %v1169_v2 = vld [vmem:[%s1374_s1 + $0x10] ss:$0 sps:$4 sm:$0x33] (!%p142_p2)  }
   0x6   : > { %145 = sbr.rel (%p142_p2) target bundleno = 311 (0x137), region = 28  ;;  %1113 = vmatprep.subr.bf16.mxu0 (!%p142_p2), %v1167_v0  ;;  %p170_p3 = scmp.lt.s32.totalorder (!%p142_p2), %s893_s18, 63  ;;  %1151 = vmatprep.subr.bf16.mxu1 (!%p142_p2), %v1167_v0  ;;  %vm367_vm0 = vcmask (!%p142_p2), 1041408   ;;  %vm318_vm1 = vcmask (!%p142_p2), 293888   ;;  %vm798_vm2 = vcmask (!%p142_p2), 1040384  }
   0x7   : > { %1114 = vmatpush3.bf16.msra.mxu0 (!%p142_p2), %v1167_v0  ;;  %1154 = vmatpush3.bf16.msra.mxu1 (!%p142_p2), %v1167_v0  ;;  %v369_v3 = vsel (!%p142_p2), %vm367_vm0, %v1169_v2, 0  ;;  %p181_p4 = scmp.lt.s32.totalorder (!%p142_p2), %s1220_s13, 1 }
   0x8   : > { %1115 = vmatprep.subr.bf16.mxu0 (!%p142_p2), %v1168_v1  ;;  %1152 = vmatprep.subr.bf16.mxu1 (!%p142_p2), %v1168_v1 }
   0xb   : > { %1116 = vmatpush3.bf16.msra.mxu0 (!%p142_p2), %v1168_v1  ;;  %1155 = vmatpush3.bf16.msra.mxu1 (!%p142_p2), %v1168_v1 }
   0xc   : > { %1157 = vmatprep.subr.msk.bf16.mxu0 (!%p142_p2), %vm367_vm0, %v1169_v2  ;;  %1158 = vmatprep.subr.msk.bf16.mxu1 (!%p142_p2), %vm367_vm0, %v1169_v2 }
   0xd   : > { %s1378_s18 = smov (!%p170_p3, %s893_s18), 63  ;;  %s1380_s13 = smov (!%p181_p4, %s1220_s13), 1 }
   0xe   : > { %s894_s21 = sshll.u32 %s1378_s18, 2  ;;  %s897_s28 = sshll.u32 %s1380_s13, 1 }
   0xf   : > { %s1242_s24 = scalar_lea.vmem %s1373_s0, %s894_s21  ;;  %1118 = vmatpush3.bf16.msra.mxu0 %v369_v3  ;;  %1156 = vmatpush3.bf16.msra.mxu1 %v369_v3  ;;  %s1281_s27 = scalar_lea.vmem %s1375_s2, %s894_s21 }
  0x10   : > { %v1170_v4 = vld [vmem:[%s1242_s24] sm:$0xff]   ;;  %v1171_v5 = vld [vmem:[%s1242_s24 + $0x8] sm:$0xff]   ;;  %v1172_v6 = vld [vmem:[%s1242_s24 + $0x10] sm:$0xff]   ;;  %s184_s4 = scalar_lea.vmem %s1376_s3, %s897_s28 }
  0x11   : > { %1119 = vmatprep.mubr.msk.bf16.mxu0 %vm318_vm1, %v1170_v4  ;;  %v1173_v7 = vld [vmem:[%s1242_s24 + $0x18] sm:$0xff]   ;;  %v1178_v8 = vld [vmem:[%s1242_s24 + $0x40] sm:$0xff]   ;;  %v1179_v9 = vld [vmem:[%s1242_s24 + $0x48] sm:$0xff]  }
  0x12   : > { %1120 = vmatmul.mubr.msk.bf16.vlgmr.msra.gmra.mrb[0].mxu0 %vm318_vm1, %v1171_v5  ;;  %1135 = vmatprep.mubr.msk.bf16.mxu1 %vm318_vm1, %v1178_v8  ;;  %v1180_v10 = vld [vmem:[%s1242_s24 + $0x50] sm:$0xff]   ;;  %v1174_v11 = vld [vmem:[%s1242_s24 + $0x20] sm:$0xff]   ;;  %v1181_v12 = vld [vmem:[%s1242_s24 + $0x58] sm:$0xff]  }
  0x13   : > { %1123 = vmatprep.mubr.msk.bf16.mxu0 %vm318_vm1, %v1172_v6  ;;  %1136 = vmatmul.mubr.msk.bf16.vlgmr.msra.gmra.mrb[0].mxu1 %vm318_vm1, %v1179_v9  ;;  %v1182_v13 = vld [vmem:[%s1242_s24 + $0x60] sm:$0xff]   ;;  %v1175_v14 = vld [vmem:[%s1242_s24 + $0x28] sm:$0xff]   ;;  %v1176_v15 = vld [vmem:[%s1242_s24 + $0x30] sm:$0xff]  }
  0x14   : > { %1139 = vmatprep.mubr.msk.bf16.mxu1 %vm318_vm1, %v1180_v10  ;;  %v1183_v16 = vld [vmem:[%s1242_s24 + $0x68] sm:$0xff]   ;;  %v1184_v17 = vld [vmem:[%s1242_s24 + $0x70] sm:$0xff]   ;;  %v1177_v18 = vld [vmem:[%s1242_s24 + $0x38] sm:$0xff]  }
  0x15   : > { %v1185_v19 = vld [vmem:[%s1242_s24 + $0x78] sm:$0xff]  }
  0x1a   : > { %1124 = vmatmul.mubr.msk.bf16.gmra.mrb[4].mxu0 %vm318_vm1, %v1173_v7 }
  0x1b   : > { %1127 = vmatprep.mubr.msk.bf16.mxu0 %vm318_vm1, %v1174_v11  ;;  %1140 = vmatmul.mubr.msk.bf16.gmra.mrb[4].mxu1 %vm318_vm1, %v1181_v12 }
  0x1c   : > { %1143 = vmatprep.mubr.msk.bf16.mxu1 %vm318_vm1, %v1182_v13 }
  0x22   : > { %1128 = vmatmul.mubr.msk.bf16.gmra.mrb[8].mxu0 %vm318_vm1, %v1175_v14 }
  0x23   : > { %1131 = vmatprep.mubr.msk.bf16.mxu0 %vm318_vm1, %v1176_v15  ;;  %1144 = vmatmul.mubr.msk.bf16.gmra.mrb[8].mxu1 %vm318_vm1, %v1183_v16 }
  0x24   : > { %1147 = vmatprep.mubr.msk.bf16.mxu1 %vm318_vm1, %v1184_v17 }
  0x2a   : > { %1132 = vmatmul.mubr.msk.bf16.gmra.mrb[12].mxu0 %vm318_vm1, %v1177_v18 }
  0x2b   : > { %1148 = vmatmul.mubr.msk.bf16.gmra.mrb[12].mxu1 %vm318_vm1, %v1185_v19 }
  0xe5   : > { %v1121_v20 = vpop.f32.mrb[0].mxu0 }
  0xe6   : > { %v405_v21 = vpop.f32.mrb[1].mxu0  ;;  %v1284_v29 = vpop.f32.mrb[0].mxu1  ;;  %v731_v30 = vmul.f32 %v1121_v20, %v1121_v20 }
  0xe7   : > { %v1122_v22 = vpop.f32.mrb[2].mxu0  ;;  %v729_v25 = vmul.f32 %v405_v21, %v405_v21  ;;  %v1287_v33 = vpop.f32.mrb[1].mxu1 }
  0xe8   : > { %v1007_v23 = vpack.c.bf16 %v1122_v22, %v1121_v20  ;;  %v408_v24 = vpop.f32.mrb[3].mxu0  ;;  %v1289_v34 = vpop.f32.mrb[2].mxu1  ;;  %v732_v35 = vmul.f32 %v1122_v22, %v1122_v22 }
  0xe9   : > { %v1002_v26 = vpack.c.bf16 %v408_v24, %v405_v21  ;;  %v692_v27 = vadd.f32 %v408_v24, %v405_v21  ;;  %v730_v28 = vmul.f32 %v408_v24, %v408_v24  ;;  %v1047_v39 = vpack.c.bf16 %v1289_v34, %v1284_v29  ;;  %v1293_v40 = vpop.f32.mrb[3].mxu1 }
  0xea   : > { %1079 = vst [vmem:[%s1281_s27 + $0x8] sm:$0xff] %v1007_v23   ;;  %v1042_v42 = vpack.c.bf16 %v1293_v40, %v1287_v33 }
  0xeb   : > { %1003 = vst [vmem:[%s1281_s27] sm:$0xff] %v1002_v26   ;;  %v693_v31 = vadd.f32 %v1121_v20, %v692_v27  ;;  %v761_v32 = vadd.f32 %v730_v28, %v729_v25  ;;  %1087 = vst [vmem:[%s1281_s27 + $0x48] sm:$0xff] %v1047_v39  }
  0xec   : > { %1086 = vst [vmem:[%s1281_s27 + $0x40] sm:$0xff] %v1042_v42  }
  0xed   : > { %v762_v36 = vadd.f32 %v761_v32, %v731_v30  ;;  %v1125_v37 = vpop.f32.mrb[4].mxu0  ;;  %v694_v38 = vadd.f32 %v1122_v22, %v693_v31 }
  0xee   : > { %v421_v41 = vpop.f32.mrb[5].mxu0  ;;  %v1300_v53 = vpop.f32.mrb[4].mxu1  ;;  %v735_v54 = vmul.f32 %v1125_v37, %v1125_v37 }
  0xef   : > { %v695_v43 = vadd.f32 %v694_v38, %v421_v41  ;;  %v733_v44 = vmul.f32 %v421_v41, %v421_v41  ;;  %v763_v45 = vadd.f32 %v762_v36, %v732_v35  ;;  %v1126_v46 = vpop.f32.mrb[6].mxu0  ;;  %v1303_v57 = vpop.f32.mrb[5].mxu1 }
  0xf0   : > { %v1017_v47 = vpack.c.bf16 %v1126_v46, %v1125_v37  ;;  %v424_v48 = vpop.f32.mrb[7].mxu0  ;;  %v1305_v58 = vpop.f32.mrb[6].mxu1  ;;  %v736_v59 = vmul.f32 %v1126_v46, %v1126_v46 }
  0xf1   : > { %v764_v49 = vadd.f32 %v763_v45, %v733_v44  ;;  %v1012_v50 = vpack.c.bf16 %v424_v48, %v421_v41  ;;  %v696_v51 = vadd.f32 %v695_v43, %v424_v48  ;;  %v734_v52 = vmul.f32 %v424_v48, %v424_v48  ;;  %v1309_v0 = vpop.f32.mrb[7].mxu1 }
  0xf2   : > { %1081 = vst [vmem:[%s1281_s27 + $0x18] sm:$0xff] %v1017_v47   ;;  %v1057_v63 = vpack.c.bf16 %v1305_v58, %v1300_v53  ;;  %v1052_v2 = vpack.c.bf16 %v1309_v0, %v1303_v57 }
  0xf3   : > { %1080 = vst [vmem:[%s1281_s27 + $0x10] sm:$0xff] %v1012_v50   ;;  %v697_v55 = vadd.f32 %v1125_v37, %v696_v51  ;;  %v765_v56 = vadd.f32 %v764_v49, %v734_v52 }
  0xf4   : > { %1089 = vst [vmem:[%s1281_s27 + $0x58] sm:$0xff] %v1057_v63   ;;  %1088 = vst [vmem:[%s1281_s27 + $0x50] sm:$0xff] %v1052_v2   ;;  %v748_v2 = vmul.f32 %v1289_v34, %v1289_v34 }
  0xf5   : > { %v766_v60 = vadd.f32 %v765_v56, %v735_v54  ;;  %v1129_v61 = vpop.f32.mrb[8].mxu0  ;;  %v698_v62 = vadd.f32 %v1126_v46, %v697_v55  ;;  %v745_v46 = vmul.f32 %v1287_v33, %v1287_v33 }
  0xf6   : > { %v437_v1 = vpop.f32.mrb[9].mxu0  ;;  %v1316_v13 = vpop.f32.mrb[8].mxu1  ;;  %v739_v14 = vmul.f32 %v1129_v61, %v1129_v61 }
  0xf7   : > { %v699_v3 = vadd.f32 %v698_v62, %v437_v1  ;;  %v737_v4 = vmul.f32 %v437_v1, %v437_v1  ;;  %v767_v5 = vadd.f32 %v766_v60, %v736_v59  ;;  %v1130_v6 = vpop.f32.mrb[10].mxu0  ;;  %v1319_v17 = vpop.f32.mrb[9].mxu1  ;;  %v747_v62 = vmul.f32 %v1284_v29, %v1284_v29 }
  0xf8   : > { %v1027_v7 = vpack.c.bf16 %v1130_v6, %v1129_v61  ;;  %v440_v8 = vpop.f32.mrb[11].mxu0  ;;  %v1321_v18 = vpop.f32.mrb[10].mxu1  ;;  %v740_v19 = vmul.f32 %v1130_v6, %v1130_v6 }
  0xf9   : > { %v768_v9 = vadd.f32 %v767_v5, %v737_v4  ;;  %v1022_v10 = vpack.c.bf16 %v440_v8, %v437_v1  ;;  %v700_v11 = vadd.f32 %v699_v3, %v440_v8  ;;  %v738_v12 = vmul.f32 %v440_v8, %v440_v8  ;;  %v504_v24 = vpop.f32.mrb[11].mxu1 }
  0xfa   : > { %1083 = vst [vmem:[%s1281_s27 + $0x28] sm:$0xff] %v1027_v7   ;;  %v1067_v23 = vpack.c.bf16 %v1321_v18, %v1316_v13  ;;  %v1062_v26 = vpack.c.bf16 %v504_v24, %v1319_v17  ;;  %v749_v4 = vmul.f32 %v1303_v57, %v1303_v57  ;;  %v750_v8 = vmul.f32 %v1309_v0, %v1309_v0 }
  0xfb   : > { %1082 = vst [vmem:[%s1281_s27 + $0x20] sm:$0xff] %v1022_v10   ;;  %v701_v15 = vadd.f32 %v1129_v61, %v700_v11  ;;  %v769_v16 = vadd.f32 %v768_v9, %v738_v12  ;;  %v746_v61 = vmul.f32 %v1293_v40, %v1293_v40 }
  0xfc   : > { %1091 = vst [vmem:[%s1281_s27 + $0x68] sm:$0xff] %v1067_v23   ;;  %1090 = vst [vmem:[%s1281_s27 + $0x60] sm:$0xff] %v1062_v26  }
  0xfd   : > { %v770_v20 = vadd.f32 %v769_v16, %v739_v14  ;;  %v1133_v21 = vpop.f32.mrb[12].mxu0  ;;  %v702_v22 = vadd.f32 %v1130_v6, %v701_v15 }
  0xfe   : > { %v453_v25 = vpop.f32.mrb[13].mxu0  ;;  %v1149_v41 = vpop.f32.mrb[12].mxu1  ;;  %v743_v42 = vmul.f32 %v1133_v21, %v1133_v21 }
  0xff   : > { %v703_v27 = vadd.f32 %v702_v22, %v453_v25  ;;  %v741_v28 = vmul.f32 %v453_v25, %v453_v25  ;;  %v771_v30 = vadd.f32 %v770_v20, %v740_v19  ;;  %v1134_v31 = vpop.f32.mrb[14].mxu0  ;;  %v517_v45 = vpop.f32.mrb[13].mxu1  ;;  %v754_v19 = vmul.f32 %v504_v24, %v504_v24 }
 0x100   : > { %v1037_v32 = vpack.c.bf16 %v1134_v31, %v1133_v21  ;;  %v456_v35 = vpop.f32.mrb[15].mxu0  ;;  %v1150_v47 = vpop.f32.mrb[14].mxu1  ;;  %v744_v48 = vmul.f32 %v1134_v31, %v1134_v31  ;;  %v755_v20 = vmul.f32 %v1316_v13, %v1316_v13  ;;  %v756_v22 = vmul.f32 %v1321_v18, %v1321_v18 }
 0x101   : > { %v772_v36 = vadd.f32 %v771_v30, %v741_v28  ;;  %v1032_v37 = vpack.c.bf16 %v456_v35, %v453_v25  ;;  %v704_v38 = vadd.f32 %v703_v27, %v456_v35  ;;  %v742_v39 = vmul.f32 %v456_v35, %v456_v35  ;;  %v520_v52 = vpop.f32.mrb[15].mxu1 }
 0x102   : > { %1085 = vst [vmem:[%s1281_s27 + $0x38] sm:$0xff] %v1037_v32   ;;  %v1077_v51 = vpack.c.bf16 %v1150_v47, %v1149_v41  ;;  %v1072_v54 = vpack.c.bf16 %v520_v52, %v517_v45  ;;  %v757_v25 = vmul.f32 %v517_v45, %v517_v45  ;;  %v759_v30 = vmul.f32 %v1149_v41, %v1149_v41 }
 0x103   : > { %1084 = vst [vmem:[%s1281_s27 + $0x30] sm:$0xff] %v1032_v37   ;;  %v705_v43 = vadd.f32 %v1133_v21, %v704_v38  ;;  %v773_v44 = vadd.f32 %v772_v36, %v742_v39  ;;  %v760_v35 = vmul.f32 %v1150_v47, %v1150_v47 }
 0x104   : > { %1093 = vst [vmem:[%s1281_s27 + $0x78] sm:$0xff] %v1077_v51   ;;  %1092 = vst [vmem:[%s1281_s27 + $0x70] sm:$0xff] %v1072_v54  }
 0x105   : > { %v774_v49 = vadd.f32 %v773_v44, %v743_v42  ;;  %v706_v50 = vadd.f32 %v1134_v31, %v705_v43 }
 0x107   : > { %v707_v55 = vadd.f32 %v706_v50, %v1287_v33  ;;  %v775_v56 = vadd.f32 %v774_v49, %v744_v48 }
 0x109   : > { %v776_v59 = vadd.f32 %v775_v56, %v745_v46  ;;  %v708_v60 = vadd.f32 %v707_v55, %v1293_v40 }
 0x10b   : > { %v709_v63 = vadd.f32 %v1284_v29, %v708_v60  ;;  %v777_v1 = vadd.f32 %v776_v59, %v746_v61  ;;  %v751_v29 = vmul.f32 %v1300_v53, %v1300_v53 }
 0x10d   : > { %v778_v3 = vadd.f32 %v777_v1, %v747_v62  ;;  %v710_v33 = vadd.f32 %v1289_v34, %v709_v63  ;;  %v752_v34 = vmul.f32 %v1305_v58, %v1305_v58 }
 0x10f   : > { %v711_v5 = vadd.f32 %v710_v33, %v1303_v57  ;;  %v779_v6 = vadd.f32 %v778_v3, %v748_v2  ;;  %v753_v57 = vmul.f32 %v1319_v17, %v1319_v17 }
 0x111   : > { %v780_v7 = vadd.f32 %v779_v6, %v749_v4  ;;  %v712_v40 = vadd.f32 %v711_v5, %v1309_v0 }
 0x113   : > { %v713_v9 = vadd.f32 %v1300_v53, %v712_v40  ;;  %v781_v10 = vadd.f32 %v780_v7, %v750_v8 }
 0x115   : > { %v782_v11 = vadd.f32 %v781_v10, %v751_v29  ;;  %v714_v12 = vadd.f32 %v1305_v58, %v713_v9 }
 0x117   : > { %v715_v14 = vadd.f32 %v714_v12, %v1319_v17  ;;  %v783_v15 = vadd.f32 %v782_v11, %v752_v34 }
 0x119   : > { %v784_v16 = vadd.f32 %v783_v15, %v753_v57  ;;  %v716_v0 = vadd.f32 %v715_v14, %v504_v24  ;;  %v758_v24 = vmul.f32 %v520_v52, %v520_v52 }
 0x11b   : > { %v717_v53 = vadd.f32 %v1316_v13, %v716_v0  ;;  %v785_v21 = vadd.f32 %v784_v16, %v754_v19 }
 0x11d   : > { %v786_v23 = vadd.f32 %v785_v21, %v755_v20  ;;  %v718_v58 = vadd.f32 %v1321_v18, %v717_v53 }
 0x11f   : > { %v719_v26 = vadd.f32 %v718_v58, %v517_v45  ;;  %v787_v17 = vadd.f32 %v786_v23, %v756_v22 }
 0x121   : > { %v788_v27 = vadd.f32 %v787_v17, %v757_v25  ;;  %v720_v28 = vadd.f32 %v719_v26, %v520_v52 }
 0x123   : > { %v721_v31 = vadd.f32 %v1149_v41, %v720_v28  ;;  %v789_v32 = vadd.f32 %v788_v27, %v758_v24 }
 0x125   : > { %v722_v13 = vadd.f32 %v1150_v47, %v721_v31  ;;  %v790_v36 = vadd.f32 %v789_v32, %v759_v30 }
 0x127   : > { %v723_v37 = vrot.slane %v722_v13, 4  ;;  %v791_v38 = vadd.f32 %v790_v36, %v760_v35 }
 0x129   : > { %v724_v39 = vadd.f32 %v723_v37, %v722_v13  ;;  %v792_v42 = vrot.slane %v791_v38, 4 }
 0x12b   : > { %v725_v43 = vrot.slane %v724_v39, 2  ;;  %v793_v18 = vadd.f32 %v792_v42, %v791_v38 }
 0x12d   : > { %v726_v44 = vadd.f32 %v725_v43, %v724_v39  ;;  %v794_v45 = vrot.slane %v793_v18, 2 }
 0x12f   : > { %v727_v46 = vrot.slane %v726_v44, 1  ;;  %v795_v48 = vadd.f32 %v794_v45, %v793_v18 }
 0x131   : > { %v796_v49 = vrot.slane %v795_v48, 1  ;;  %v728_v41 = vadd.f32 %v727_v46, %v726_v44 }
 0x133   : > { %v797_v47 = vadd.f32 %v796_v49, %v795_v48 }
 0x135   : > { %v799_v50 = vsel %vm798_vm2, %v728_v41, %v797_v47 }
 0x136   : > { %800 = vst [vmem:[%s184_s4] sm:$0x3] %v799_v50 }
 0x137 PF: > { %s14_s12 = sadd.s32 1, %s1192_s12  }
 0x138   : > { %p11_p5 = scmp.ge.s32.totalorder %s14_s12, 4  }
 0x13a   :  { %13 = sbr.rel (!%p11_p5) target bundleno = 1 (0x1), region = 70 }

// kernel: residual_block_forward.5
= control target key start
LH: loop header
LB: loop body
LE: loop exit
PB: predicated region body
PF: predicated region fallthrough
CT: control target
= control target key end

     0   :  { %s1502_s0 = inlined_call_operand.vmem [shape: bf16[512,128], index: 0, kind: input, shape index: {}]   ;;  %s1503_s1 = inlined_call_operand.vmem [shape: f32[1,128], index: 1, kind: input, shape index: {}]   ;;  %s1504_s2 = inlined_call_operand.vmem [shape: f32[1,128], index: 2, kind: input, shape index: {}]   ;;  %s1505_s3 = inlined_call_operand.vmem [shape: bf16[512,128], index: 3, kind: output, shape index: {}]  }
   0x1   :  { %v803_v0 = vld [vmem:[%s1502_s0] sm:$0xff]   ;;  %v1090_v4 = vld [vmem:[%s1502_s0 + $0x8] sm:$0xff]   ;;  %v1091_v5 = vld [vmem:[%s1502_s0 + $0x10] sm:$0xff]  }
   0x2   :  { %v1178_v1 = vld [vmem:[%s1503_s1] ss:$0 sm:$0xff]  ;;  %v804_v2 = vunpack.c.l.bf16 %v803_v0  ;;  %v805_v3 = vunpack.c.h.bf16 %v803_v0  ;;  %v1092_v6 = vld [vmem:[%s1502_s0 + $0x18] sm:$0xff]   ;;  %v808_v8 = vunpack.c.l.bf16 %v1090_v4  ;;  %v809_v9 = vunpack.c.h.bf16 %v1090_v4  ;;  %v1094_v33 = vld [vmem:[%s1502_s0 + $0x28] sm:$0xff]  }
   0x3   :  { %v1192_v7 = vld [vmem:[%s1504_s2] ss:$0 sm:$0xff]  ;;  %v812_v10 = vunpack.c.l.bf16 %v1091_v5  ;;  %v813_v11 = vunpack.c.h.bf16 %v1091_v5  ;;  %v816_v14 = vunpack.c.l.bf16 %v1092_v6  ;;  %v817_v15 = vunpack.c.h.bf16 %v1092_v6  ;;  %v1095_v38 = vld [vmem:[%s1502_s0 + $0x30] sm:$0xff]   ;;  %v1096_v43 = vld [vmem:[%s1502_s0 + $0x38] sm:$0xff]  }
   0x4   :  { %v149_v12 = vmul.f32 %v804_v2, %v1178_v1  ;;  %v150_v13 = vmul.f32 %v805_v3, %v1178_v1  ;;  %v151_v16 = vmul.f32 %v808_v8, %v1178_v1  ;;  %v152_v17 = vmul.f32 %v809_v9, %v1178_v1  ;;  %v1093_v28 = vld [vmem:[%s1502_s0 + $0x20] sm:$0xff]  }
   0x5   :  { %v153_v18 = vmul.f32 %v812_v10, %v1178_v1  ;;  %v154_v19 = vmul.f32 %v813_v11, %v1178_v1  ;;  %v155_v22 = vmul.f32 %v816_v14, %v1178_v1  ;;  %v156_v23 = vmul.f32 %v817_v15, %v1178_v1  ;;  %v1097_v0 = vld [vmem:[%s1502_s0 + $0x40] sm:$0xff]   ;;  %v1098_v11 = vld [vmem:[%s1502_s0 + $0x48] sm:$0xff]  }
   0x6   :  { %v220_v20 = vadd.f32 %v1192_v7, %v149_v12  ;;  %v221_v21 = vadd.f32 %v1192_v7, %v150_v13  ;;  %v222_v24 = vadd.f32 %v1192_v7, %v151_v16  ;;  %v223_v25 = vadd.f32 %v1192_v7, %v152_v17  ;;  %v1099_v16 = vld [vmem:[%s1502_s0 + $0x50] sm:$0xff]  }
   0x7   :  { %v224_v26 = vadd.f32 %v1192_v7, %v153_v18  ;;  %v225_v27 = vadd.f32 %v1192_v7, %v154_v19  ;;  %v226_v31 = vadd.f32 %v1192_v7, %v155_v22  ;;  %v227_v32 = vadd.f32 %v1192_v7, %v156_v23 }
   0x8   :  { %v284_v29 = vmax.f32 %v220_v20, 0.0  ;;  %v285_v30 = vmax.f32 %v221_v21, 0.0  ;;  %v286_v34 = vmax.f32 %v222_v24, 0.0  ;;  %v287_v35 = vmax.f32 %v223_v25, 0.0  ;;  %v1100_v25 = vld [vmem:[%s1502_s0 + $0x58] sm:$0xff]  }
   0x9   :  { %v288_v36 = vmax.f32 %v224_v26, 0.0  ;;  %v289_v37 = vmax.f32 %v225_v27, 0.0  ;;  %v290_v40 = vmax.f32 %v226_v31, 0.0  ;;  %v291_v41 = vmax.f32 %v227_v32, 0.0 }
   0xa   :  { %v933_v39 = vpack.c.bf16 %v285_v30, %v284_v29  ;;  %v820_v42 = vunpack.c.l.bf16 %v1093_v28  ;;  %v938_v44 = vpack.c.bf16 %v287_v35, %v286_v34  ;;  %v821_v46 = vunpack.c.h.bf16 %v1093_v28 }
   0xb   :  { %v943_v45 = vpack.c.bf16 %v289_v37, %v288_v36  ;;  %v824_v47 = vunpack.c.l.bf16 %v1094_v33  ;;  %v948_v48 = vpack.c.bf16 %v291_v41, %v290_v40  ;;  %v825_v50 = vunpack.c.h.bf16 %v1094_v33 }
   0xc   :  { %934 = vst [vmem:[%s1505_s3] sm:$0xff] %v933_v39   ;;  %v157_v49 = vmul.f32 %v820_v42, %v1178_v1  ;;  %v828_v51 = vunpack.c.l.bf16 %v1095_v38  ;;  %1121 = vst [vmem:[%s1505_s3 + $0x8] sm:$0xff] %v938_v44   ;;  %v158_v52 = vmul.f32 %v821_v46, %v1178_v1  ;;  %v829_v54 = vunpack.c.h.bf16 %v1095_v38  ;;  %v1101_v38 = vld [vmem:[%s1502_s0 + $0x60] sm:$0xff]  }
   0xd   :  { %1122 = vst [vmem:[%s1505_s3 + $0x10] sm:$0xff] %v943_v45   ;;  %v159_v53 = vmul.f32 %v824_v47, %v1178_v1  ;;  %v832_v55 = vunpack.c.l.bf16 %v1096_v43  ;;  %1123 = vst [vmem:[%s1505_s3 + $0x18] sm:$0xff] %v948_v48   ;;  %v160_v57 = vmul.f32 %v825_v50, %v1178_v1  ;;  %v833_v59 = vunpack.c.h.bf16 %v1096_v43 }
   0xe   :  { %v228_v56 = vadd.f32 %v1192_v7, %v157_v49  ;;  %v161_v58 = vmul.f32 %v828_v51, %v1178_v1  ;;  %v229_v60 = vadd.f32 %v1192_v7, %v158_v52  ;;  %v162_v62 = vmul.f32 %v829_v54, %v1178_v1  ;;  %v1102_v51 = vld [vmem:[%s1502_s0 + $0x68] sm:$0xff]  }
   0xf   :  { %v230_v61 = vadd.f32 %v1192_v7, %v159_v53  ;;  %v163_v63 = vmul.f32 %v832_v55, %v1178_v1  ;;  %v231_v3 = vadd.f32 %v1192_v7, %v160_v57  ;;  %v164_v5 = vmul.f32 %v833_v59, %v1178_v1 }
  0x10   :  { %v292_v2 = vmax.f32 %v228_v56, 0.0  ;;  %v232_v4 = vadd.f32 %v1192_v7, %v161_v58  ;;  %v293_v6 = vmax.f32 %v229_v60, 0.0  ;;  %v233_v9 = vadd.f32 %v1192_v7, %v162_v62  ;;  %v1103_v60 = vld [vmem:[%s1502_s0 + $0x70] sm:$0xff]  }
  0x11   :  { %v294_v8 = vmax.f32 %v230_v61, 0.0  ;;  %v234_v10 = vadd.f32 %v1192_v7, %v163_v63  ;;  %v295_v12 = vmax.f32 %v231_v3, 0.0  ;;  %v235_v14 = vadd.f32 %v1192_v7, %v164_v5 }
  0x12   :  { %v296_v13 = vmax.f32 %v232_v4, 0.0  ;;  %v836_v15 = vunpack.c.l.bf16 %v1097_v0  ;;  %v953_v17 = vpack.c.bf16 %v293_v6, %v292_v2  ;;  %v297_v18 = vmax.f32 %v233_v9, 0.0  ;;  %v1104_v2 = vld [vmem:[%s1502_s0 + $0x78] sm:$0xff]  }
  0x13   :  { %v298_v19 = vmax.f32 %v234_v10, 0.0  ;;  %v837_v20 = vunpack.c.h.bf16 %v1097_v0  ;;  %v958_v21 = vpack.c.bf16 %v295_v12, %v294_v8  ;;  %v299_v22 = vmax.f32 %v235_v14, 0.0  ;;  %v1105_v12 = vld [vmem:[%s1502_s0 + $0x80] sm:$0xff]  }
  0x14   :  { %v165_v23 = vmul.f32 %v836_v15, %v1178_v1  ;;  %v840_v24 = vunpack.c.l.bf16 %v1098_v11  ;;  %1124 = vst [vmem:[%s1505_s3 + $0x20] sm:$0xff] %v953_v17   ;;  %v963_v26 = vpack.c.bf16 %v297_v18, %v296_v13  ;;  %v841_v28 = vunpack.c.h.bf16 %v1098_v11 }
  0x15   :  { %v166_v27 = vmul.f32 %v837_v20, %v1178_v1  ;;  %v844_v29 = vunpack.c.l.bf16 %v1099_v16  ;;  %1125 = vst [vmem:[%s1505_s3 + $0x28] sm:$0xff] %v958_v21   ;;  %v968_v30 = vpack.c.bf16 %v299_v22, %v298_v19  ;;  %v845_v33 = vunpack.c.h.bf16 %v1099_v16 }
  0x16   :  { %v236_v31 = vadd.f32 %v1192_v7, %v165_v23  ;;  %v167_v32 = vmul.f32 %v840_v24, %v1178_v1  ;;  %1126 = vst [vmem:[%s1505_s3 + $0x30] sm:$0xff] %v963_v26   ;;  %v168_v35 = vmul.f32 %v841_v28, %v1178_v1  ;;  %v848_v37 = vunpack.c.l.bf16 %v1100_v25 }
  0x17   :  { %v237_v34 = vadd.f32 %v1192_v7, %v166_v27  ;;  %v169_v36 = vmul.f32 %v844_v29, %v1178_v1  ;;  %1127 = vst [vmem:[%s1505_s3 + $0x38] sm:$0xff] %v968_v30   ;;  %v170_v41 = vmul.f32 %v845_v33, %v1178_v1  ;;  %v849_v42 = vunpack.c.h.bf16 %v1100_v25  ;;  %v1106_v29 = vld [vmem:[%s1502_s0 + $0x88] sm:$0xff]  }
  0x18   :  { %v300_v39 = vmax.f32 %v236_v31, 0.0  ;;  %v238_v40 = vadd.f32 %v1192_v7, %v167_v32  ;;  %v239_v44 = vadd.f32 %v1192_v7, %v168_v35  ;;  %v171_v46 = vmul.f32 %v848_v37, %v1178_v1 }
  0x19   :  { %v301_v43 = vmax.f32 %v237_v34, 0.0  ;;  %v240_v45 = vadd.f32 %v1192_v7, %v169_v36  ;;  %v241_v48 = vadd.f32 %v1192_v7, %v170_v41  ;;  %v172_v49 = vmul.f32 %v849_v42, %v1178_v1  ;;  %v1107_v34 = vld [vmem:[%s1502_s0 + $0x90] sm:$0xff]  }
  0x1a   :  { %v302_v47 = vmax.f32 %v238_v40, 0.0  ;;  %v852_v50 = vunpack.c.l.bf16 %v1101_v38  ;;  %v303_v53 = vmax.f32 %v239_v44, 0.0  ;;  %v242_v55 = vadd.f32 %v1192_v7, %v171_v46 }
  0x1b   :  { %v973_v52 = vpack.c.bf16 %v301_v43, %v300_v39  ;;  %v304_v54 = vmax.f32 %v240_v45, 0.0  ;;  %v305_v56 = vmax.f32 %v241_v48, 0.0  ;;  %v243_v57 = vadd.f32 %v1192_v7, %v172_v49  ;;  %v1108_v43 = vld [vmem:[%s1502_s0 + $0x98] sm:$0xff]  }
  0x1c   :  { %v853_v58 = vunpack.c.h.bf16 %v1101_v38  ;;  %v173_v59 = vmul.f32 %v852_v50, %v1178_v1  ;;  %v978_v61 = vpack.c.bf16 %v303_v53, %v302_v47  ;;  %v306_v62 = vmax.f32 %v242_v55, 0.0 }
  0x1d   :  { %1128 = vst [vmem:[%s1505_s3 + $0x40] sm:$0xff] %v973_v52   ;;  %v856_v63 = vunpack.c.l.bf16 %v1102_v51  ;;  %v857_v0 = vunpack.c.h.bf16 %v1102_v51  ;;  %v983_v3 = vpack.c.bf16 %v305_v56, %v304_v54  ;;  %v307_v4 = vmax.f32 %v243_v57, 0.0  ;;  %v1109_v56 = vld [vmem:[%s1502_s0 + $0xa0] sm:$0xff]  }
  0x1e   :  { %v174_v5 = vmul.f32 %v853_v58, %v1178_v1  ;;  %v244_v6 = vadd.f32 %v1192_v7, %v173_v59  ;;  %1129 = vst [vmem:[%s1505_s3 + $0x48] sm:$0xff] %v978_v61   ;;  %v860_v10 = vunpack.c.l.bf16 %v1103_v60  ;;  %v861_v11 = vunpack.c.h.bf16 %v1103_v60 }
  0x1f   :  { %v175_v8 = vmul.f32 %v856_v63, %v1178_v1  ;;  %v176_v9 = vmul.f32 %v857_v0, %v1178_v1  ;;  %1130 = vst [vmem:[%s1505_s3 + $0x50] sm:$0xff] %v983_v3   ;;  %v988_v13 = vpack.c.bf16 %v307_v4, %v306_v62  ;;  %v864_v16 = vunpack.c.l.bf16 %v1104_v2 }
  0x20   :  { %v245_v14 = vadd.f32 %v1192_v7, %v174_v5  ;;  %v308_v15 = vmax.f32 %v244_v6, 0.0  ;;  %v177_v19 = vmul.f32 %v860_v10, %v1178_v1  ;;  %v178_v20 = vmul.f32 %v861_v11, %v1178_v1 }
  0x21   :  { %v246_v17 = vadd.f32 %v1192_v7, %v175_v8  ;;  %v247_v18 = vadd.f32 %v1192_v7, %v176_v9  ;;  %1131 = vst [vmem:[%s1505_s3 + $0x58] sm:$0xff] %v988_v13   ;;  %v865_v22 = vunpack.c.h.bf16 %v1104_v2  ;;  %v179_v23 = vmul.f32 %v864_v16, %v1178_v1  ;;  %v1110_v2 = vld [vmem:[%s1502_s0 + $0xa8] sm:$0xff]   ;;  %v1111_v16 = vld [vmem:[%s1502_s0 + $0xb0] sm:$0xff]  }
  0x22   :  { %v309_v21 = vmax.f32 %v245_v14, 0.0  ;;  %v868_v24 = vunpack.c.l.bf16 %v1105_v12  ;;  %v248_v27 = vadd.f32 %v1192_v7, %v177_v19  ;;  %v249_v28 = vadd.f32 %v1192_v7, %v178_v20 }
  0x23   :  { %v310_v25 = vmax.f32 %v246_v17, 0.0  ;;  %v311_v26 = vmax.f32 %v247_v18, 0.0  ;;  %v180_v31 = vmul.f32 %v865_v22, %v1178_v1  ;;  %v250_v32 = vadd.f32 %v1192_v7, %v179_v23 }
  0x24   :  { %v993_v30 = vpack.c.bf16 %v309_v21, %v308_v15  ;;  %v869_v33 = vunpack.c.h.bf16 %v1105_v12  ;;  %v312_v36 = vmax.f32 %v248_v27, 0.0  ;;  %v313_v37 = vmax.f32 %v249_v28, 0.0  ;;  %v1112_v21 = vld [vmem:[%s1502_s0 + $0xb8] sm:$0xff]  }
  0x25   :  { %v998_v35 = vpack.c.bf16 %v311_v26, %v310_v25  ;;  %v181_v38 = vmul.f32 %v868_v24, %v1178_v1  ;;  %v251_v39 = vadd.f32 %v1192_v7, %v180_v31  ;;  %v314_v40 = vmax.f32 %v250_v32, 0.0 }
  0x26   :  { %1132 = vst [vmem:[%s1505_s3 + $0x60] sm:$0xff] %v993_v30   ;;  %v182_v41 = vmul.f32 %v869_v33, %v1178_v1  ;;  %v872_v42 = vunpack.c.l.bf16 %v1106_v29  ;;  %v1003_v44 = vpack.c.bf16 %v313_v37, %v312_v36  ;;  %v873_v46 = vunpack.c.h.bf16 %v1106_v29 }
  0x27   :  { %1133 = vst [vmem:[%s1505_s3 + $0x68] sm:$0xff] %v998_v35   ;;  %v252_v45 = vadd.f32 %v1192_v7, %v181_v38  ;;  %v876_v47 = vunpack.c.l.bf16 %v1107_v34  ;;  %v315_v48 = vmax.f32 %v251_v39, 0.0  ;;  %v877_v51 = vunpack.c.h.bf16 %v1107_v34  ;;  %v1113_v34 = vld [vmem:[%s1502_s0 + $0xc0] sm:$0xff]  }
  0x28   :  { %v253_v49 = vadd.f32 %v1192_v7, %v182_v41  ;;  %v183_v50 = vmul.f32 %v872_v42, %v1178_v1  ;;  %1134 = vst [vmem:[%s1505_s3 + $0x70] sm:$0xff] %v1003_v44   ;;  %v184_v53 = vmul.f32 %v873_v46, %v1178_v1  ;;  %v880_v55 = vunpack.c.l.bf16 %v1108_v43 }
  0x29   :  { %v316_v52 = vmax.f32 %v252_v45, 0.0  ;;  %v185_v54 = vmul.f32 %v876_v47, %v1178_v1  ;;  %v1008_v57 = vpack.c.bf16 %v315_v48, %v314_v40  ;;  %v186_v60 = vmul.f32 %v877_v51, %v1178_v1  ;;  %v1114_v47 = vld [vmem:[%s1502_s0 + $0xc8] sm:$0xff]  }
  0x2a   :  { %v317_v58 = vmax.f32 %v253_v49, 0.0  ;;  %v254_v59 = vadd.f32 %v1192_v7, %v183_v50  ;;  %v255_v61 = vadd.f32 %v1192_v7, %v184_v53  ;;  %v881_v63 = vunpack.c.h.bf16 %v1108_v43 }
  0x2b   :  { %v256_v62 = vadd.f32 %v1192_v7, %v185_v54  ;;  %v187_v0 = vmul.f32 %v880_v55, %v1178_v1  ;;  %1135 = vst [vmem:[%s1505_s3 + $0x78] sm:$0xff] %v1008_v57   ;;  %v257_v5 = vadd.f32 %v1192_v7, %v186_v60  ;;  %v884_v6 = vunpack.c.l.bf16 %v1109_v56 }
  0x2c   :  { %v1013_v3 = vpack.c.bf16 %v317_v58, %v316_v52  ;;  %v318_v4 = vmax.f32 %v254_v59, 0.0  ;;  %v319_v8 = vmax.f32 %v255_v61, 0.0  ;;  %v188_v10 = vmul.f32 %v881_v63, %v1178_v1  ;;  %v1115_v52 = vld [vmem:[%s1502_s0 + $0xd0] sm:$0xff]   ;;  %v1116_v61 = vld [vmem:[%s1502_s0 + $0xd8] sm:$0xff]  }
  0x2d   :  { %v320_v9 = vmax.f32 %v256_v62, 0.0  ;;  %v258_v11 = vadd.f32 %v1192_v7, %v187_v0  ;;  %v321_v12 = vmax.f32 %v257_v5, 0.0  ;;  %v885_v13 = vunpack.c.h.bf16 %v1109_v56 }
  0x2e   :  { %1136 = vst [vmem:[%s1505_s3 + $0x80] sm:$0xff] %v1013_v3   ;;  %v189_v14 = vmul.f32 %v884_v6, %v1178_v1  ;;  %v888_v15 = vunpack.c.l.bf16 %v1110_v2  ;;  %v1018_v17 = vpack.c.bf16 %v319_v8, %v318_v4  ;;  %v259_v18 = vadd.f32 %v1192_v7, %v188_v10 }
  0x2f   :  { %v322_v19 = vmax.f32 %v258_v11, 0.0  ;;  %v889_v20 = vunpack.c.h.bf16 %v1110_v2  ;;  %v1023_v22 = vpack.c.bf16 %v321_v12, %v320_v9  ;;  %v190_v23 = vmul.f32 %v885_v13, %v1178_v1  ;;  %v1117_v12 = vld [vmem:[%s1502_s0 + $0xe0] sm:$0xff]  }
  0x30   :  { %v260_v24 = vadd.f32 %v1192_v7, %v189_v14  ;;  %v191_v25 = vmul.f32 %v888_v15, %v1178_v1  ;;  %1137 = vst [vmem:[%s1505_s3 + $0x88] sm:$0xff] %v1018_v17   ;;  %v323_v26 = vmax.f32 %v259_v18, 0.0  ;;  %v892_v28 = vunpack.c.l.bf16 %v1111_v16 }
  0x31   :  { %v192_v27 = vmul.f32 %v889_v20, %v1178_v1  ;;  %v893_v29 = vunpack.c.h.bf16 %v1111_v16  ;;  %1138 = vst [vmem:[%s1505_s3 + $0x90] sm:$0xff] %v1023_v22   ;;  %v261_v30 = vadd.f32 %v1192_v7, %v190_v23  ;;  %v896_v33 = vunpack.c.l.bf16 %v1112_v21 }
  0x32   :  { %v324_v31 = vmax.f32 %v260_v24, 0.0  ;;  %v262_v32 = vadd.f32 %v1192_v7, %v191_v25  ;;  %v1028_v35 = vpack.c.bf16 %v323_v26, %v322_v19  ;;  %v193_v37 = vmul.f32 %v892_v28, %v1178_v1 }
  0x33   :  { %v263_v36 = vadd.f32 %v1192_v7, %v192_v27  ;;  %v194_v38 = vmul.f32 %v893_v29, %v1178_v1  ;;  %v325_v39 = vmax.f32 %v261_v30, 0.0  ;;  %v897_v41 = vunpack.c.h.bf16 %v1112_v21  ;;  %v1118_v21 = vld [vmem:[%s1502_s0 + $0xe8] sm:$0xff]  }
  0x34   :  { %v326_v40 = vmax.f32 %v262_v32, 0.0  ;;  %v195_v42 = vmul.f32 %v896_v33, %v1178_v1  ;;  %1139 = vst [vmem:[%s1505_s3 + $0x98] sm:$0xff] %v1028_v35   ;;  %v264_v44 = vadd.f32 %v1192_v7, %v193_v37  ;;  %v900_v46 = vunpack.c.l.bf16 %v1113_v34 }
  0x35   :  { %v327_v43 = vmax.f32 %v263_v36, 0.0  ;;  %v265_v45 = vadd.f32 %v1192_v7, %v194_v38  ;;  %v1033_v48 = vpack.c.bf16 %v325_v39, %v324_v31  ;;  %v196_v49 = vmul.f32 %v897_v41, %v1178_v1  ;;  %v1120_v39 = vld [vmem:[%s1502_s0 + $0xf8] sm:$0xff]  }
  0x36   :  { %v266_v50 = vadd.f32 %v1192_v7, %v195_v42  ;;  %v901_v51 = vunpack.c.h.bf16 %v1113_v34  ;;  %v328_v54 = vmax.f32 %v264_v44, 0.0  ;;  %v197_v56 = vmul.f32 %v900_v46, %v1178_v1  ;;  %v1119_v34 = vld [vmem:[%s1502_s0 + $0xf0] sm:$0xff]  }
  0x37   :  { %v1038_v53 = vpack.c.bf16 %v327_v43, %v326_v40  ;;  %v329_v55 = vmax.f32 %v265_v45, 0.0  ;;  %1140 = vst [vmem:[%s1505_s3 + $0xa0] sm:$0xff] %v1033_v48   ;;  %v267_v57 = vadd.f32 %v1192_v7, %v196_v49  ;;  %v904_v60 = vunpack.c.l.bf16 %v1114_v47 }
  0x38   :  { %v330_v58 = vmax.f32 %v266_v50, 0.0  ;;  %v198_v59 = vmul.f32 %v901_v51, %v1178_v1  ;;  %v268_v63 = vadd.f32 %v1192_v7, %v197_v56  ;;  %v905_v0 = vunpack.c.h.bf16 %v1114_v47 }
  0x39   :  { %1141 = vst [vmem:[%s1505_s3 + $0xa8] sm:$0xff] %v1038_v53   ;;  %v1043_v62 = vpack.c.bf16 %v329_v55, %v328_v54  ;;  %v908_v2 = vunpack.c.l.bf16 %v1115_v52  ;;  %v331_v3 = vmax.f32 %v267_v57, 0.0  ;;  %v199_v5 = vmul.f32 %v904_v60, %v1178_v1 }
  0x3a   :  { %v269_v4 = vadd.f32 %v1192_v7, %v198_v59  ;;  %v909_v6 = vunpack.c.h.bf16 %v1115_v52  ;;  %v332_v8 = vmax.f32 %v268_v63, 0.0  ;;  %v200_v9 = vmul.f32 %v905_v0, %v1178_v1 }
  0x3b   :  { %1142 = vst [vmem:[%s1505_s3 + $0xb0] sm:$0xff] %v1043_v62   ;;  %v201_v10 = vmul.f32 %v908_v2, %v1178_v1  ;;  %v912_v11 = vunpack.c.l.bf16 %v1116_v61  ;;  %v1048_v13 = vpack.c.bf16 %v331_v3, %v330_v58  ;;  %v270_v15 = vadd.f32 %v1192_v7, %v199_v5 }
  0x3c   :  { %v333_v14 = vmax.f32 %v269_v4, 0.0  ;;  %v202_v16 = vmul.f32 %v909_v6, %v1178_v1  ;;  %v271_v17 = vadd.f32 %v1192_v7, %v200_v9  ;;  %v913_v19 = vunpack.c.h.bf16 %v1116_v61 }
  0x3d   :  { %v272_v18 = vadd.f32 %v1192_v7, %v201_v10  ;;  %v203_v20 = vmul.f32 %v912_v11, %v1178_v1  ;;  %1143 = vst [vmem:[%s1505_s3 + $0xb8] sm:$0xff] %v1048_v13   ;;  %v334_v23 = vmax.f32 %v270_v15, 0.0  ;;  %v916_v25 = vunpack.c.l.bf16 %v1117_v12 }
  0x3e   :  { %v1053_v22 = vpack.c.bf16 %v333_v14, %v332_v8  ;;  %v273_v24 = vadd.f32 %v1192_v7, %v202_v16  ;;  %v335_v26 = vmax.f32 %v271_v17, 0.0  ;;  %v204_v28 = vmul.f32 %v913_v19, %v1178_v1 }
  0x3f   :  { %v336_v27 = vmax.f32 %v272_v18, 0.0  ;;  %v274_v29 = vadd.f32 %v1192_v7, %v203_v20  ;;  %v917_v31 = vunpack.c.h.bf16 %v1117_v12  ;;  %v205_v32 = vmul.f32 %v916_v25, %v1178_v1 }
  0x40   :  { %1144 = vst [vmem:[%s1505_s3 + $0xc0] sm:$0xff] %v1053_v22   ;;  %v337_v30 = vmax.f32 %v273_v24, 0.0  ;;  %v920_v33 = vunpack.c.l.bf16 %v1118_v21  ;;  %v1058_v35 = vpack.c.bf16 %v335_v26, %v334_v23  ;;  %v275_v36 = vadd.f32 %v1192_v7, %v204_v28 }
  0x41   :  { %v338_v37 = vmax.f32 %v274_v29, 0.0  ;;  %v921_v38 = vunpack.c.h.bf16 %v1118_v21  ;;  %v206_v41 = vmul.f32 %v917_v31, %v1178_v1  ;;  %v276_v42 = vadd.f32 %v1192_v7, %v205_v32 }
  0x42   :  { %v1063_v40 = vpack.c.bf16 %v337_v30, %v336_v27  ;;  %v207_v43 = vmul.f32 %v920_v33, %v1178_v1  ;;  %1145 = vst [vmem:[%s1505_s3 + $0xc8] sm:$0xff] %v1058_v35   ;;  %v339_v44 = vmax.f32 %v275_v36, 0.0  ;;  %v924_v46 = vunpack.c.l.bf16 %v1119_v34 }
  0x43   :  { %v208_v45 = vmul.f32 %v921_v38, %v1178_v1  ;;  %v925_v47 = vunpack.c.h.bf16 %v1119_v34  ;;  %v277_v48 = vadd.f32 %v1192_v7, %v206_v41  ;;  %v340_v49 = vmax.f32 %v276_v42, 0.0 }
  0x44   :  { %1146 = vst [vmem:[%s1505_s3 + $0xd0] sm:$0xff] %v1063_v40   ;;  %v278_v50 = vadd.f32 %v1192_v7, %v207_v43  ;;  %v928_v51 = vunpack.c.l.bf16 %v1120_v39  ;;  %v1068_v52 = vpack.c.bf16 %v339_v44, %v338_v37  ;;  %v209_v54 = vmul.f32 %v924_v46, %v1178_v1 }
  0x45   :  { %v279_v53 = vadd.f32 %v1192_v7, %v208_v45  ;;  %v210_v55 = vmul.f32 %v925_v47, %v1178_v1  ;;  %v341_v56 = vmax.f32 %v277_v48, 0.0  ;;  %v929_v58 = vunpack.c.h.bf16 %v1120_v39 }
  0x46   :  { %v342_v57 = vmax.f32 %v278_v50, 0.0  ;;  %v211_v59 = vmul.f32 %v928_v51, %v1178_v1  ;;  %1147 = vst [vmem:[%s1505_s3 + $0xd8] sm:$0xff] %v1068_v52   ;;  %v280_v61 = vadd.f32 %v1192_v7, %v209_v54 }
  0x47   :  { %v343_v60 = vmax.f32 %v279_v53, 0.0  ;;  %v281_v62 = vadd.f32 %v1192_v7, %v210_v55  ;;  %v1073_v63 = vpack.c.bf16 %v341_v56, %v340_v49  ;;  %v212_v0 = vmul.f32 %v929_v58, %v1178_v1 }
  0x48   :  { %v282_v2 = vadd.f32 %v1192_v7, %v211_v59  ;;  %v344_v4 = vmax.f32 %v280_v61, 0.0 }
  0x49   :  { %v1078_v3 = vpack.c.bf16 %v343_v60, %v342_v57  ;;  %v345_v5 = vmax.f32 %v281_v62, 0.0  ;;  %1148 = vst [vmem:[%s1505_s3 + $0xe0] sm:$0xff] %v1073_v63   ;;  %v283_v6 = vadd.f32 %v1192_v7, %v212_v0 }
  0x4a   :  { %v346_v8 = vmax.f32 %v282_v2, 0.0 }
  0x4b   :  { %1149 = vst [vmem:[%s1505_s3 + $0xe8] sm:$0xff] %v1078_v3   ;;  %v1083_v9 = vpack.c.bf16 %v345_v5, %v344_v4  ;;  %v347_v10 = vmax.f32 %v283_v6, 0.0 }
  0x4d   :  { %1150 = vst [vmem:[%s1505_s3 + $0xf0] sm:$0xff] %v1083_v9   ;;  %v1088_v1 = vpack.c.bf16 %v347_v10, %v346_v8 }
  0x4f   :  { %1151 = vst [vmem:[%s1505_s3 + $0xf8] sm:$0xff] %v1088_v1  }

// kernel: residual_block_forward.7
= control target key start
LH: loop header
LB: loop body
LE: loop exit
PB: predicated region body
PF: predicated region fallthrough
CT: control target
= control target key end

     0   :  { %s1478_s0 = inlined_call_operand.vmem [shape: bf16[512,128], index: 0, kind: input, shape index: {}]   ;;  %s1479_s1 = inlined_call_operand.vmem [shape: f32[1,128], index: 1, kind: input, shape index: {}]   ;;  %s1480_s2 = inlined_call_operand.vmem [shape: f32[1,128], index: 2, kind: input, shape index: {}]   ;;  %s1481_s3 = inlined_call_operand.vmem [shape: bf16[512,128], index: 3, kind: input, shape index: {}]   ;;  %s1482_s4 = inlined_call_operand.vmem [shape: f32[512,128], index: 4, kind: output, shape index: {}]  }
   0x1   :  { %v614_v0 = vld [vmem:[%s1478_s0] sm:$0xff]   ;;  %v869_v5 = vld [vmem:[%s1478_s0 + $0x8] sm:$0xff]   ;;  %v870_v12 = vld [vmem:[%s1478_s0 + $0x10] sm:$0xff]  }
   0x2   :  { %v962_v1 = vld [vmem:[%s1479_s1] ss:$0 sm:$0xff]  ;;  %v615_v2 = vunpack.c.l.bf16 %v614_v0  ;;  %v616_v4 = vunpack.c.h.bf16 %v614_v0  ;;  %v900_v6 = vld [vmem:[%s1481_s3 + $0x8] sm:$0xff]   ;;  %v619_v10 = vunpack.c.l.bf16 %v869_v5  ;;  %v901_v13 = vld [vmem:[%s1481_s3 + $0x10] sm:$0xff]   ;;  %v620_v16 = vunpack.c.h.bf16 %v869_v5 }
   0x3   :  { %v742_v3 = vld [vmem:[%s1481_s3] sm:$0xff]   ;;  %v747_v11 = vunpack.c.l.bf16 %v900_v6  ;;  %v748_v17 = vunpack.c.h.bf16 %v900_v6  ;;  %v871_v18 = vld [vmem:[%s1478_s0 + $0x18] sm:$0xff]   ;;  %v623_v20 = vunpack.c.l.bf16 %v870_v12  ;;  %v751_v21 = vunpack.c.l.bf16 %v901_v13  ;;  %v873_v54 = vld [vmem:[%s1478_s0 + $0x28] sm:$0xff]  }
   0x4   :  { %v976_v7 = vld [vmem:[%s1480_s2] ss:$0 sm:$0xff]  ;;  %v743_v8 = vunpack.c.l.bf16 %v742_v3  ;;  %v744_v9 = vunpack.c.h.bf16 %v742_v3  ;;  %v152_v14 = vmul.f32 %v615_v2, %v962_v1  ;;  %v153_v15 = vmul.f32 %v616_v4, %v962_v1  ;;  %v902_v23 = vld [vmem:[%s1481_s3 + $0x18] sm:$0xff]   ;;  %v904_v55 = vld [vmem:[%s1481_s3 + $0x28] sm:$0xff]  }
   0x5   :  { %v154_v19 = vmul.f32 %v619_v10, %v962_v1  ;;  %v624_v22 = vunpack.c.h.bf16 %v870_v12  ;;  %v155_v26 = vmul.f32 %v620_v16, %v962_v1  ;;  %v752_v27 = vunpack.c.h.bf16 %v901_v13  ;;  %v872_v40 = vld [vmem:[%s1478_s0 + $0x20] sm:$0xff]   ;;  %v874_v0 = vld [vmem:[%s1478_s0 + $0x30] sm:$0xff]   ;;  %v875_v16 = vld [vmem:[%s1478_s0 + $0x38] sm:$0xff]  }
   0x6   :  { %v223_v24 = vadd.f32 %v976_v7, %v152_v14  ;;  %v224_v25 = vadd.f32 %v976_v7, %v153_v15  ;;  %v156_v29 = vmul.f32 %v623_v20, %v962_v1  ;;  %v627_v31 = vunpack.c.l.bf16 %v871_v18  ;;  %v903_v45 = vld [vmem:[%s1481_s3 + $0x20] sm:$0xff]   ;;  %v905_v2 = vld [vmem:[%s1481_s3 + $0x30] sm:$0xff]  }
   0x7   :  { %v225_v28 = vadd.f32 %v976_v7, %v154_v19  ;;  %v157_v30 = vmul.f32 %v624_v22, %v962_v1  ;;  %v226_v34 = vadd.f32 %v976_v7, %v155_v26  ;;  %v755_v35 = vunpack.c.l.bf16 %v902_v23 }
   0x8   :  { %v415_v32 = vadd.f32 %v743_v8, %v223_v24  ;;  %v416_v33 = vadd.f32 %v744_v9, %v224_v25  ;;  %v227_v37 = vadd.f32 %v976_v7, %v156_v29  ;;  %v158_v39 = vmul.f32 %v627_v31, %v962_v1 }
   0x9   :  { %v417_v36 = vadd.f32 %v747_v11, %v225_v28  ;;  %v228_v38 = vadd.f32 %v976_v7, %v157_v30  ;;  %v418_v43 = vadd.f32 %v748_v17, %v226_v34  ;;  %v628_v44 = vunpack.c.h.bf16 %v871_v18  ;;  %v876_v34 = vld [vmem:[%s1478_s0 + $0x40] sm:$0xff]  }
   0xa   :  { %v479_v41 = vmax.f32 %v415_v32, 0.0  ;;  %v480_v42 = vmax.f32 %v416_v33, 0.0  ;;  %v419_v47 = vadd.f32 %v751_v21, %v227_v37  ;;  %v229_v49 = vadd.f32 %v976_v7, %v158_v39  ;;  %v906_v21 = vld [vmem:[%s1481_s3 + $0x38] sm:$0xff]   ;;  %v907_v39 = vld [vmem:[%s1481_s3 + $0x40] sm:$0xff]  }
   0xb   :  { %v481_v46 = vmax.f32 %v417_v36, 0.0  ;;  %v420_v48 = vadd.f32 %v752_v27, %v228_v38  ;;  %v482_v50 = vmax.f32 %v418_v43, 0.0  ;;  %v159_v51 = vmul.f32 %v628_v44, %v962_v1 }
   0xc   :  { %543 = vst [vmem:[%s1482_s4] sm:$0xff] %v479_v41  ;;  %544 = vst [vmem:[%s1482_s4 + $0x8] sm:$0xff] %v480_v42  ;;  %v756_v52 = vunpack.c.h.bf16 %v902_v23  ;;  %v631_v53 = vunpack.c.l.bf16 %v872_v40  ;;  %v483_v56 = vmax.f32 %v419_v47, 0.0  ;;  %v421_v58 = vadd.f32 %v755_v35, %v229_v49  ;;  %v908_v49 = vld [vmem:[%s1481_s3 + $0x48] sm:$0xff]  }
   0xd   :  { %545 = vst [vmem:[%s1482_s4 + $0x10] sm:$0xff] %v481_v46  ;;  %v484_v57 = vmax.f32 %v420_v48, 0.0  ;;  %v759_v59 = vunpack.c.l.bf16 %v903_v45  ;;  %546 = vst [vmem:[%s1482_s4 + $0x18] sm:$0xff] %v482_v50  ;;  %v230_v60 = vadd.f32 %v976_v7, %v159_v51  ;;  %v632_v62 = vunpack.c.h.bf16 %v872_v40  ;;  %v877_v48 = vld [vmem:[%s1478_s0 + $0x48] sm:$0xff]  }
   0xe   :  { %v160_v61 = vmul.f32 %v631_v53, %v962_v1  ;;  %v760_v63 = vunpack.c.h.bf16 %v903_v45  ;;  %547 = vst [vmem:[%s1482_s4 + $0x20] sm:$0xff] %v483_v56  ;;  %v485_v3 = vmax.f32 %v421_v58, 0.0  ;;  %v635_v4 = vunpack.c.l.bf16 %v873_v54  ;;  %v878_v58 = vld [vmem:[%s1478_s0 + $0x50] sm:$0xff]  }
   0xf   :  { %548 = vst [vmem:[%s1482_s4 + $0x28] sm:$0xff] %v484_v57  ;;  %v763_v5 = vunpack.c.l.bf16 %v904_v55  ;;  %v636_v6 = vunpack.c.h.bf16 %v873_v54  ;;  %v422_v8 = vadd.f32 %v756_v52, %v230_v60  ;;  %v161_v10 = vmul.f32 %v632_v62, %v962_v1 }
  0x10   :  { %v231_v9 = vadd.f32 %v976_v7, %v160_v61  ;;  %v764_v11 = vunpack.c.h.bf16 %v904_v55  ;;  %549 = vst [vmem:[%s1482_s4 + $0x30] sm:$0xff] %v485_v3  ;;  %v162_v12 = vmul.f32 %v635_v4, %v962_v1  ;;  %v639_v14 = vunpack.c.l.bf16 %v874_v0 }
  0x11   :  { %v163_v13 = vmul.f32 %v636_v6, %v962_v1  ;;  %v767_v15 = vunpack.c.l.bf16 %v905_v2  ;;  %v486_v17 = vmax.f32 %v422_v8, 0.0  ;;  %v232_v19 = vadd.f32 %v976_v7, %v161_v10  ;;  %v879_v10 = vld [vmem:[%s1478_s0 + $0x58] sm:$0xff]  }
  0x12   :  { %v423_v18 = vadd.f32 %v759_v59, %v231_v9  ;;  %v640_v20 = vunpack.c.h.bf16 %v874_v0  ;;  %v233_v22 = vadd.f32 %v976_v7, %v162_v12  ;;  %v164_v24 = vmul.f32 %v639_v14, %v962_v1 }
  0x13   :  { %v234_v23 = vadd.f32 %v976_v7, %v163_v13  ;;  %v768_v25 = vunpack.c.h.bf16 %v905_v2  ;;  %550 = vst [vmem:[%s1482_s4 + $0x38] sm:$0xff] %v486_v17  ;;  %v424_v27 = vadd.f32 %v760_v63, %v232_v19  ;;  %v643_v29 = vunpack.c.l.bf16 %v875_v16  ;;  %v909_v63 = vld [vmem:[%s1481_s3 + $0x50] sm:$0xff]   ;;  %v910_v19 = vld [vmem:[%s1481_s3 + $0x58] sm:$0xff]  }
  0x14   :  { %v487_v26 = vmax.f32 %v423_v18, 0.0  ;;  %v165_v28 = vmul.f32 %v640_v20, %v962_v1  ;;  %v425_v30 = vadd.f32 %v763_v5, %v233_v22  ;;  %v235_v32 = vadd.f32 %v976_v7, %v164_v24 }
  0x15   :  { %v426_v31 = vadd.f32 %v764_v11, %v234_v23  ;;  %v771_v33 = vunpack.c.l.bf16 %v906_v21  ;;  %v488_v35 = vmax.f32 %v424_v27, 0.0  ;;  %v166_v37 = vmul.f32 %v643_v29, %v962_v1 }
  0x16   :  { %551 = vst [vmem:[%s1482_s4 + $0x40] sm:$0xff] %v487_v26  ;;  %v236_v36 = vadd.f32 %v976_v7, %v165_v28  ;;  %v644_v38 = vunpack.c.h.bf16 %v875_v16  ;;  %v489_v40 = vmax.f32 %v425_v30, 0.0  ;;  %v427_v42 = vadd.f32 %v767_v15, %v235_v32  ;;  %v880_v28 = vld [vmem:[%s1478_s0 + $0x60] sm:$0xff]  }
  0x17   :  { %v490_v41 = vmax.f32 %v426_v31, 0.0  ;;  %v772_v43 = vunpack.c.h.bf16 %v906_v21  ;;  %552 = vst [vmem:[%s1482_s4 + $0x48] sm:$0xff] %v488_v35  ;;  %v237_v45 = vadd.f32 %v976_v7, %v166_v37  ;;  %v647_v47 = vunpack.c.l.bf16 %v876_v34 }
  0x18   :  { %v428_v44 = vadd.f32 %v768_v25, %v236_v36  ;;  %v167_v46 = vmul.f32 %v644_v38, %v962_v1  ;;  %553 = vst [vmem:[%s1482_s4 + $0x50] sm:$0xff] %v489_v40  ;;  %v491_v50 = vmax.f32 %v427_v42, 0.0  ;;  %v775_v51 = vunpack.c.l.bf16 %v907_v39  ;;  %v881_v42 = vld [vmem:[%s1478_s0 + $0x68] sm:$0xff]  }
  0x19   :  { %554 = vst [vmem:[%s1482_s4 + $0x58] sm:$0xff] %v490_v41  ;;  %v648_v52 = vunpack.c.h.bf16 %v876_v34  ;;  %v776_v53 = vunpack.c.h.bf16 %v907_v39  ;;  %v429_v55 = vadd.f32 %v771_v33, %v237_v45  ;;  %v168_v57 = vmul.f32 %v647_v47, %v962_v1  ;;  %v911_v33 = vld [vmem:[%s1481_s3 + $0x60] sm:$0xff]  }
  0x1a   :  { %v492_v54 = vmax.f32 %v428_v44, 0.0  ;;  %v238_v56 = vadd.f32 %v976_v7, %v167_v46  ;;  %555 = vst [vmem:[%s1482_s4 + $0x60] sm:$0xff] %v491_v50  ;;  %v651_v60 = vunpack.c.l.bf16 %v877_v48  ;;  %v779_v61 = vunpack.c.l.bf16 %v908_v49 }
  0x1b   :  { %v169_v59 = vmul.f32 %v648_v52, %v962_v1  ;;  %v652_v62 = vunpack.c.h.bf16 %v877_v48  ;;  %v493_v0 = vmax.f32 %v429_v55, 0.0  ;;  %v239_v3 = vadd.f32 %v976_v7, %v168_v57  ;;  %v882_v52 = vld [vmem:[%s1478_s0 + $0x70] sm:$0xff]  }
  0x1c   :  { %556 = vst [vmem:[%s1482_s4 + $0x68] sm:$0xff] %v492_v54  ;;  %v430_v2 = vadd.f32 %v772_v43, %v238_v56  ;;  %v780_v4 = vunpack.c.h.bf16 %v908_v49  ;;  %v170_v6 = vmul.f32 %v651_v60, %v962_v1  ;;  %v655_v9 = vunpack.c.l.bf16 %v878_v58  ;;  %v912_v43 = vld [vmem:[%s1481_s3 + $0x68] sm:$0xff]   ;;  %v913_v57 = vld [vmem:[%s1481_s3 + $0x70] sm:$0xff]  }
  0x1d   :  { %v240_v5 = vadd.f32 %v976_v7, %v169_v59  ;;  %v171_v8 = vmul.f32 %v652_v62, %v962_v1  ;;  %557 = vst [vmem:[%s1482_s4 + $0x70] sm:$0xff] %v493_v0  ;;  %v431_v12 = vadd.f32 %v775_v51, %v239_v3  ;;  %v783_v13 = vunpack.c.l.bf16 %v909_v63  ;;  %v883_v3 = vld [vmem:[%s1478_s0 + $0x78] sm:$0xff]  }
  0x1e   :  { %v494_v11 = vmax.f32 %v430_v2, 0.0  ;;  %v656_v14 = vunpack.c.h.bf16 %v878_v58  ;;  %v241_v16 = vadd.f32 %v976_v7, %v170_v6  ;;  %v172_v18 = vmul.f32 %v655_v9, %v962_v1 }
  0x1f   :  { %v432_v15 = vadd.f32 %v776_v53, %v240_v5  ;;  %v242_v17 = vadd.f32 %v976_v7, %v171_v8  ;;  %v495_v20 = vmax.f32 %v431_v12, 0.0  ;;  %v784_v22 = vunpack.c.h.bf16 %v909_v63 }
  0x20   :  { %558 = vst [vmem:[%s1482_s4 + $0x78] sm:$0xff] %v494_v11  ;;  %v173_v21 = vmul.f32 %v656_v14, %v962_v1  ;;  %v659_v23 = vunpack.c.l.bf16 %v879_v10  ;;  %v433_v25 = vadd.f32 %v779_v61, %v241_v16  ;;  %v243_v27 = vadd.f32 %v976_v7, %v172_v18 }
  0x21   :  { %v496_v24 = vmax.f32 %v432_v15, 0.0  ;;  %v434_v26 = vadd.f32 %v780_v4, %v242_v17  ;;  %559 = vst [vmem:[%s1482_s4 + $0x80] sm:$0xff] %v495_v20  ;;  %v787_v31 = vunpack.c.l.bf16 %v910_v19  ;;  %v660_v32 = vunpack.c.h.bf16 %v879_v10 }
  0x22   :  { %v244_v29 = vadd.f32 %v976_v7, %v173_v21  ;;  %v174_v30 = vmul.f32 %v659_v23, %v962_v1  ;;  %v497_v34 = vmax.f32 %v433_v25, 0.0  ;;  %v435_v36 = vadd.f32 %v783_v13, %v243_v27  ;;  %v914_v13 = vld [vmem:[%s1481_s3 + $0x78] sm:$0xff]   ;;  %v915_v27 = vld [vmem:[%s1481_s3 + $0x80] sm:$0xff]  }
  0x23   :  { %560 = vst [vmem:[%s1482_s4 + $0x88] sm:$0xff] %v496_v24  ;;  %v498_v35 = vmax.f32 %v434_v26, 0.0  ;;  %v788_v37 = vunpack.c.h.bf16 %v910_v19  ;;  %v175_v40 = vmul.f32 %v660_v32, %v962_v1  ;;  %v663_v41 = vunpack.c.l.bf16 %v880_v28 }
  0x24   :  { %v436_v38 = vadd.f32 %v784_v22, %v244_v29  ;;  %v245_v39 = vadd.f32 %v976_v7, %v174_v30  ;;  %561 = vst [vmem:[%s1482_s4 + $0x90] sm:$0xff] %v497_v34  ;;  %v499_v44 = vmax.f32 %v435_v36, 0.0  ;;  %v791_v45 = vunpack.c.l.bf16 %v911_v33  ;;  %v884_v22 = vld [vmem:[%s1478_s0 + $0x80] sm:$0xff]   ;;  %v885_v36 = vld [vmem:[%s1478_s0 + $0x88] sm:$0xff]  }
  0x25   :  { %562 = vst [vmem:[%s1482_s4 + $0x98] sm:$0xff] %v498_v35  ;;  %v664_v46 = vunpack.c.h.bf16 %v880_v28  ;;  %v792_v47 = vunpack.c.h.bf16 %v911_v33  ;;  %v246_v50 = vadd.f32 %v976_v7, %v175_v40  ;;  %v176_v51 = vmul.f32 %v663_v41, %v962_v1 }
  0x26   :  { %v500_v48 = vmax.f32 %v436_v38, 0.0  ;;  %v437_v49 = vadd.f32 %v787_v31, %v245_v39  ;;  %563 = vst [vmem:[%s1482_s4 + $0xa0] sm:$0xff] %v499_v44  ;;  %v667_v54 = vunpack.c.l.bf16 %v881_v42  ;;  %v795_v55 = vunpack.c.l.bf16 %v912_v43 }
  0x27   :  { %v177_v53 = vmul.f32 %v664_v46, %v962_v1  ;;  %v668_v56 = vunpack.c.h.bf16 %v881_v42  ;;  %v438_v59 = vadd.f32 %v788_v37, %v246_v50  ;;  %v247_v60 = vadd.f32 %v976_v7, %v176_v51  ;;  %v916_v37 = vld [vmem:[%s1481_s3 + $0x88] sm:$0xff]   ;;  %v886_v46 = vld [vmem:[%s1478_s0 + $0x90] sm:$0xff]  }
  0x28   :  { %564 = vst [vmem:[%s1482_s4 + $0xa8] sm:$0xff] %v500_v48  ;;  %v501_v58 = vmax.f32 %v437_v49, 0.0  ;;  %v796_v61 = vunpack.c.h.bf16 %v912_v43  ;;  %v178_v63 = vmul.f32 %v667_v54, %v962_v1  ;;  %v671_v2 = vunpack.c.l.bf16 %v882_v52  ;;  %v917_v51 = vld [vmem:[%s1481_s3 + $0x90] sm:$0xff]  }
  0x29   :  { %v248_v62 = vadd.f32 %v976_v7, %v177_v53  ;;  %v179_v0 = vmul.f32 %v668_v56, %v962_v1  ;;  %v502_v4 = vmax.f32 %v438_v59, 0.0  ;;  %v439_v5 = vadd.f32 %v791_v45, %v247_v60  ;;  %v887_v60 = vld [vmem:[%s1478_s0 + $0x98] sm:$0xff]  }
  0x2a   :  { %565 = vst [vmem:[%s1482_s4 + $0xb0] sm:$0xff] %v501_v58  ;;  %v799_v6 = vunpack.c.l.bf16 %v913_v57  ;;  %v672_v8 = vunpack.c.h.bf16 %v882_v52  ;;  %v249_v10 = vadd.f32 %v976_v7, %v178_v63  ;;  %v180_v12 = vmul.f32 %v671_v2, %v962_v1 }
  0x2b   :  { %v440_v9 = vadd.f32 %v792_v47, %v248_v62  ;;  %v250_v11 = vadd.f32 %v976_v7, %v179_v0  ;;  %566 = vst [vmem:[%s1482_s4 + $0xb8] sm:$0xff] %v502_v4  ;;  %v503_v14 = vmax.f32 %v439_v5, 0.0  ;;  %v800_v16 = vunpack.c.h.bf16 %v913_v57 }
  0x2c   :  { %v181_v15 = vmul.f32 %v672_v8, %v962_v1  ;;  %v675_v17 = vunpack.c.l.bf16 %v883_v3  ;;  %v441_v19 = vadd.f32 %v795_v55, %v249_v10  ;;  %v251_v21 = vadd.f32 %v976_v7, %v180_v12 }
  0x2d   :  { %v504_v18 = vmax.f32 %v440_v9, 0.0  ;;  %v442_v20 = vadd.f32 %v796_v61, %v250_v11  ;;  %567 = vst [vmem:[%s1482_s4 + $0xc0] sm:$0xff] %v503_v14  ;;  %v803_v25 = vunpack.c.l.bf16 %v914_v13  ;;  %v676_v26 = vunpack.c.h.bf16 %v883_v3 }
  0x2e   :  { %v252_v23 = vadd.f32 %v976_v7, %v181_v15  ;;  %v182_v24 = vmul.f32 %v675_v17, %v962_v1  ;;  %v505_v28 = vmax.f32 %v441_v19, 0.0  ;;  %v443_v30 = vadd.f32 %v799_v6, %v251_v21  ;;  %v918_v6 = vld [vmem:[%s1481_s3 + $0x98] sm:$0xff]   ;;  %v919_v21 = vld [vmem:[%s1481_s3 + $0xa0] sm:$0xff]  }
  0x2f   :  { %568 = vst [vmem:[%s1482_s4 + $0xc8] sm:$0xff] %v504_v18  ;;  %v506_v29 = vmax.f32 %v442_v20, 0.0  ;;  %v804_v31 = vunpack.c.h.bf16 %v914_v13  ;;  %v183_v34 = vmul.f32 %v676_v26, %v962_v1  ;;  %v679_v35 = vunpack.c.l.bf16 %v884_v22 }
  0x30   :  { %v444_v32 = vadd.f32 %v800_v16, %v252_v23  ;;  %v253_v33 = vadd.f32 %v976_v7, %v182_v24  ;;  %569 = vst [vmem:[%s1482_s4 + $0xd0] sm:$0xff] %v505_v28  ;;  %v507_v38 = vmax.f32 %v443_v30, 0.0  ;;  %v807_v39 = vunpack.c.l.bf16 %v915_v27  ;;  %v888_v16 = vld [vmem:[%s1478_s0 + $0xa0] sm:$0xff]   ;;  %v889_v30 = vld [vmem:[%s1478_s0 + $0xa8] sm:$0xff]  }
  0x31   :  { %570 = vst [vmem:[%s1482_s4 + $0xd8] sm:$0xff] %v506_v29  ;;  %v680_v40 = vunpack.c.h.bf16 %v884_v22  ;;  %v808_v41 = vunpack.c.h.bf16 %v915_v27  ;;  %v254_v44 = vadd.f32 %v976_v7, %v183_v34  ;;  %v184_v45 = vmul.f32 %v679_v35, %v962_v1 }
  0x32   :  { %v508_v42 = vmax.f32 %v444_v32, 0.0  ;;  %v445_v43 = vadd.f32 %v803_v25, %v253_v33  ;;  %571 = vst [vmem:[%s1482_s4 + $0xe0] sm:$0xff] %v507_v38  ;;  %v683_v48 = vunpack.c.l.bf16 %v885_v36  ;;  %v811_v49 = vunpack.c.l.bf16 %v916_v37 }
  0x33   :  { %v185_v47 = vmul.f32 %v680_v40, %v962_v1  ;;  %v684_v50 = vunpack.c.h.bf16 %v885_v36  ;;  %v446_v53 = vadd.f32 %v804_v31, %v254_v44  ;;  %v255_v54 = vadd.f32 %v976_v7, %v184_v45  ;;  %v920_v31 = vld [vmem:[%s1481_s3 + $0xa8] sm:$0xff]   ;;  %v890_v40 = vld [vmem:[%s1478_s0 + $0xb0] sm:$0xff]  }
  0x34   :  { %572 = vst [vmem:[%s1482_s4 + $0xe8] sm:$0xff] %v508_v42  ;;  %v509_v52 = vmax.f32 %v445_v43, 0.0  ;;  %v812_v55 = vunpack.c.h.bf16 %v916_v37  ;;  %v186_v57 = vmul.f32 %v683_v48, %v962_v1  ;;  %v687_v59 = vunpack.c.l.bf16 %v886_v46  ;;  %v921_v45 = vld [vmem:[%s1481_s3 + $0xb0] sm:$0xff]  }
  0x35   :  { %v256_v56 = vadd.f32 %v976_v7, %v185_v47  ;;  %v187_v58 = vmul.f32 %v684_v50, %v962_v1  ;;  %v510_v61 = vmax.f32 %v446_v53, 0.0  ;;  %v447_v62 = vadd.f32 %v807_v39, %v255_v54  ;;  %v891_v54 = vld [vmem:[%s1478_s0 + $0xb8] sm:$0xff]  }
  0x36   :  { %573 = vst [vmem:[%s1482_s4 + $0xf0] sm:$0xff] %v509_v52  ;;  %v815_v63 = vunpack.c.l.bf16 %v917_v51  ;;  %v688_v0 = vunpack.c.h.bf16 %v886_v46  ;;  %v257_v3 = vadd.f32 %v976_v7, %v186_v57  ;;  %v188_v5 = vmul.f32 %v687_v59, %v962_v1 }
  0x37   :  { %v448_v2 = vadd.f32 %v808_v41, %v256_v56  ;;  %v258_v4 = vadd.f32 %v976_v7, %v187_v58  ;;  %574 = vst [vmem:[%s1482_s4 + $0xf8] sm:$0xff] %v510_v61  ;;  %v511_v8 = vmax.f32 %v447_v62, 0.0  ;;  %v816_v10 = vunpack.c.h.bf16 %v917_v51 }
  0x38   :  { %v189_v9 = vmul.f32 %v688_v0, %v962_v1  ;;  %v691_v11 = vunpack.c.l.bf16 %v887_v60  ;;  %v449_v13 = vadd.f32 %v811_v49, %v257_v3  ;;  %v259_v15 = vadd.f32 %v976_v7, %v188_v5 }
  0x39   :  { %v512_v12 = vmax.f32 %v448_v2, 0.0  ;;  %v450_v14 = vadd.f32 %v812_v55, %v258_v4  ;;  %575 = vst [vmem:[%s1482_s4 + $0x100] sm:$0xff] %v511_v8  ;;  %v819_v19 = vunpack.c.l.bf16 %v918_v6  ;;  %v692_v20 = vunpack.c.h.bf16 %v887_v60 }
  0x3a   :  { %v260_v17 = vadd.f32 %v976_v7, %v189_v9  ;;  %v190_v18 = vmul.f32 %v691_v11, %v962_v1  ;;  %v513_v22 = vmax.f32 %v449_v13, 0.0  ;;  %v451_v24 = vadd.f32 %v815_v63, %v259_v15  ;;  %v922_v63 = vld [vmem:[%s1481_s3 + $0xb8] sm:$0xff]   ;;  %v923_v15 = vld [vmem:[%s1481_s3 + $0xc0] sm:$0xff]  }
  0x3b   :  { %576 = vst [vmem:[%s1482_s4 + $0x108] sm:$0xff] %v512_v12  ;;  %v514_v23 = vmax.f32 %v450_v14, 0.0  ;;  %v820_v25 = vunpack.c.h.bf16 %v918_v6  ;;  %v191_v28 = vmul.f32 %v692_v20, %v962_v1  ;;  %v695_v29 = vunpack.c.l.bf16 %v888_v16 }
  0x3c   :  { %v452_v26 = vadd.f32 %v816_v10, %v260_v17  ;;  %v261_v27 = vadd.f32 %v976_v7, %v190_v18  ;;  %577 = vst [vmem:[%s1482_s4 + $0x110] sm:$0xff] %v513_v22  ;;  %v515_v32 = vmax.f32 %v451_v24, 0.0  ;;  %v823_v33 = vunpack.c.l.bf16 %v919_v21  ;;  %v892_v10 = vld [vmem:[%s1478_s0 + $0xc0] sm:$0xff]   ;;  %v893_v24 = vld [vmem:[%s1478_s0 + $0xc8] sm:$0xff]  }
  0x3d   :  { %578 = vst [vmem:[%s1482_s4 + $0x118] sm:$0xff] %v514_v23  ;;  %v696_v34 = vunpack.c.h.bf16 %v888_v16  ;;  %v824_v35 = vunpack.c.h.bf16 %v919_v21  ;;  %v262_v38 = vadd.f32 %v976_v7, %v191_v28  ;;  %v192_v39 = vmul.f32 %v695_v29, %v962_v1 }
  0x3e   :  { %v516_v36 = vmax.f32 %v452_v26, 0.0  ;;  %v453_v37 = vadd.f32 %v819_v19, %v261_v27  ;;  %579 = vst [vmem:[%s1482_s4 + $0x120] sm:$0xff] %v515_v32  ;;  %v699_v42 = vunpack.c.l.bf16 %v889_v30  ;;  %v827_v43 = vunpack.c.l.bf16 %v920_v31 }
  0x3f   :  { %v193_v41 = vmul.f32 %v696_v34, %v962_v1  ;;  %v700_v44 = vunpack.c.h.bf16 %v889_v30  ;;  %v454_v47 = vadd.f32 %v820_v25, %v262_v38  ;;  %v263_v48 = vadd.f32 %v976_v7, %v192_v39  ;;  %v924_v25 = vld [vmem:[%s1481_s3 + $0xc8] sm:$0xff]   ;;  %v894_v34 = vld [vmem:[%s1478_s0 + $0xd0] sm:$0xff]  }
  0x40   :  { %580 = vst [vmem:[%s1482_s4 + $0x128] sm:$0xff] %v516_v36  ;;  %v517_v46 = vmax.f32 %v453_v37, 0.0  ;;  %v828_v49 = vunpack.c.h.bf16 %v920_v31  ;;  %v194_v51 = vmul.f32 %v699_v42, %v962_v1  ;;  %v703_v53 = vunpack.c.l.bf16 %v890_v40  ;;  %v925_v39 = vld [vmem:[%s1481_s3 + $0xd0] sm:$0xff]  }
  0x41   :  { %v264_v50 = vadd.f32 %v976_v7, %v193_v41  ;;  %v195_v52 = vmul.f32 %v700_v44, %v962_v1  ;;  %v518_v55 = vmax.f32 %v454_v47, 0.0  ;;  %v455_v56 = vadd.f32 %v823_v33, %v263_v48  ;;  %v895_v48 = vld [vmem:[%s1478_s0 + $0xd8] sm:$0xff]  }
  0x42   :  { %581 = vst [vmem:[%s1482_s4 + $0x130] sm:$0xff] %v517_v46  ;;  %v831_v57 = vunpack.c.l.bf16 %v921_v45  ;;  %v704_v58 = vunpack.c.h.bf16 %v890_v40  ;;  %v265_v60 = vadd.f32 %v976_v7, %v194_v51  ;;  %v196_v62 = vmul.f32 %v703_v53, %v962_v1 }
  0x43   :  { %v456_v59 = vadd.f32 %v824_v35, %v264_v50  ;;  %v266_v61 = vadd.f32 %v976_v7, %v195_v52  ;;  %582 = vst [vmem:[%s1482_s4 + $0x138] sm:$0xff] %v518_v55  ;;  %v519_v0 = vmax.f32 %v455_v56, 0.0  ;;  %v832_v3 = vunpack.c.h.bf16 %v921_v45 }
  0x44   :  { %v197_v2 = vmul.f32 %v704_v58, %v962_v1  ;;  %v707_v4 = vunpack.c.l.bf16 %v891_v54  ;;  %v457_v6 = vadd.f32 %v827_v43, %v265_v60  ;;  %v267_v9 = vadd.f32 %v976_v7, %v196_v62 }
  0x45   :  { %v520_v5 = vmax.f32 %v456_v59, 0.0  ;;  %v458_v8 = vadd.f32 %v828_v49, %v266_v61  ;;  %583 = vst [vmem:[%s1482_s4 + $0x140] sm:$0xff] %v519_v0  ;;  %v835_v13 = vunpack.c.l.bf16 %v922_v63  ;;  %v708_v14 = vunpack.c.h.bf16 %v891_v54 }
  0x46   :  { %v268_v11 = vadd.f32 %v976_v7, %v197_v2  ;;  %v198_v12 = vmul.f32 %v707_v4, %v962_v1  ;;  %v521_v16 = vmax.f32 %v457_v6, 0.0  ;;  %v459_v18 = vadd.f32 %v831_v57, %v267_v9  ;;  %v926_v57 = vld [vmem:[%s1481_s3 + $0xd8] sm:$0xff]   ;;  %v927_v9 = vld [vmem:[%s1481_s3 + $0xe0] sm:$0xff]  }
  0x47   :  { %584 = vst [vmem:[%s1482_s4 + $0x148] sm:$0xff] %v520_v5  ;;  %v522_v17 = vmax.f32 %v458_v8, 0.0  ;;  %v836_v19 = vunpack.c.h.bf16 %v922_v63  ;;  %v199_v22 = vmul.f32 %v708_v14, %v962_v1  ;;  %v711_v23 = vunpack.c.l.bf16 %v892_v10 }
  0x48   :  { %v460_v20 = vadd.f32 %v832_v3, %v268_v11  ;;  %v269_v21 = vadd.f32 %v976_v7, %v198_v12  ;;  %585 = vst [vmem:[%s1482_s4 + $0x150] sm:$0xff] %v521_v16  ;;  %v523_v26 = vmax.f32 %v459_v18, 0.0  ;;  %v839_v27 = vunpack.c.l.bf16 %v923_v15  ;;  %v896_v3 = vld [vmem:[%s1478_s0 + $0xe0] sm:$0xff]   ;;  %v897_v18 = vld [vmem:[%s1478_s0 + $0xe8] sm:$0xff]  }
  0x49   :  { %586 = vst [vmem:[%s1482_s4 + $0x158] sm:$0xff] %v522_v17  ;;  %v712_v28 = vunpack.c.h.bf16 %v892_v10  ;;  %v840_v29 = vunpack.c.h.bf16 %v923_v15  ;;  %v270_v32 = vadd.f32 %v976_v7, %v199_v22  ;;  %v200_v33 = vmul.f32 %v711_v23, %v962_v1 }
  0x4a   :  { %v524_v30 = vmax.f32 %v460_v20, 0.0  ;;  %v461_v31 = vadd.f32 %v835_v13, %v269_v21  ;;  %587 = vst [vmem:[%s1482_s4 + $0x160] sm:$0xff] %v523_v26  ;;  %v715_v36 = vunpack.c.l.bf16 %v893_v24  ;;  %v843_v37 = vunpack.c.l.bf16 %v924_v25 }
  0x4b   :  { %v201_v35 = vmul.f32 %v712_v28, %v962_v1  ;;  %v716_v38 = vunpack.c.h.bf16 %v893_v24  ;;  %v462_v41 = vadd.f32 %v836_v19, %v270_v32  ;;  %v271_v42 = vadd.f32 %v976_v7, %v200_v33  ;;  %v928_v19 = vld [vmem:[%s1481_s3 + $0xe8] sm:$0xff]   ;;  %v898_v28 = vld [vmem:[%s1478_s0 + $0xf0] sm:$0xff]  }
  0x4c   :  { %588 = vst [vmem:[%s1482_s4 + $0x168] sm:$0xff] %v524_v30  ;;  %v525_v40 = vmax.f32 %v461_v31, 0.0  ;;  %v844_v43 = vunpack.c.h.bf16 %v924_v25  ;;  %v202_v45 = vmul.f32 %v715_v36, %v962_v1  ;;  %v719_v47 = vunpack.c.l.bf16 %v894_v34  ;;  %v929_v33 = vld [vmem:[%s1481_s3 + $0xf0] sm:$0xff]  }
  0x4d   :  { %v272_v44 = vadd.f32 %v976_v7, %v201_v35  ;;  %v203_v46 = vmul.f32 %v716_v38, %v962_v1  ;;  %v526_v49 = vmax.f32 %v462_v41, 0.0  ;;  %v463_v50 = vadd.f32 %v839_v27, %v271_v42  ;;  %v899_v42 = vld [vmem:[%s1478_s0 + $0xf8] sm:$0xff]  }
  0x4e   :  { %589 = vst [vmem:[%s1482_s4 + $0x170] sm:$0xff] %v525_v40  ;;  %v847_v51 = vunpack.c.l.bf16 %v925_v39  ;;  %v720_v52 = vunpack.c.h.bf16 %v894_v34  ;;  %v273_v54 = vadd.f32 %v976_v7, %v202_v45  ;;  %v204_v56 = vmul.f32 %v719_v47, %v962_v1 }
  0x4f   :  { %v464_v53 = vadd.f32 %v840_v29, %v272_v44  ;;  %v274_v55 = vadd.f32 %v976_v7, %v203_v46  ;;  %590 = vst [vmem:[%s1482_s4 + $0x178] sm:$0xff] %v526_v49  ;;  %v527_v58 = vmax.f32 %v463_v50, 0.0  ;;  %v848_v60 = vunpack.c.h.bf16 %v925_v39 }
  0x50   :  { %v205_v59 = vmul.f32 %v720_v52, %v962_v1  ;;  %v723_v61 = vunpack.c.l.bf16 %v895_v48  ;;  %v465_v63 = vadd.f32 %v843_v37, %v273_v54  ;;  %v275_v2 = vadd.f32 %v976_v7, %v204_v56 }
  0x51   :  { %v528_v62 = vmax.f32 %v464_v53, 0.0  ;;  %v466_v0 = vadd.f32 %v844_v43, %v274_v55  ;;  %591 = vst [vmem:[%s1482_s4 + $0x180] sm:$0xff] %v527_v58  ;;  %v851_v6 = vunpack.c.l.bf16 %v926_v57  ;;  %v724_v8 = vunpack.c.h.bf16 %v895_v48 }
  0x52   :  { %v276_v4 = vadd.f32 %v976_v7, %v205_v59  ;;  %v206_v5 = vmul.f32 %v723_v61, %v962_v1  ;;  %v529_v10 = vmax.f32 %v465_v63, 0.0  ;;  %v467_v12 = vadd.f32 %v847_v51, %v275_v2  ;;  %v930_v51 = vld [vmem:[%s1481_s3 + $0xf8] sm:$0xff]  }
  0x53   :  { %592 = vst [vmem:[%s1482_s4 + $0x188] sm:$0xff] %v528_v62  ;;  %v530_v11 = vmax.f32 %v466_v0, 0.0  ;;  %v852_v13 = vunpack.c.h.bf16 %v926_v57  ;;  %v207_v16 = vmul.f32 %v724_v8, %v962_v1  ;;  %v727_v17 = vunpack.c.l.bf16 %v896_v3 }
  0x54   :  { %v468_v14 = vadd.f32 %v848_v60, %v276_v4  ;;  %v277_v15 = vadd.f32 %v976_v7, %v206_v5  ;;  %593 = vst [vmem:[%s1482_s4 + $0x190] sm:$0xff] %v529_v10  ;;  %v531_v20 = vmax.f32 %v467_v12, 0.0  ;;  %v855_v21 = vunpack.c.l.bf16 %v927_v9 }
  0x55   :  { %594 = vst [vmem:[%s1482_s4 + $0x198] sm:$0xff] %v530_v11  ;;  %v728_v22 = vunpack.c.h.bf16 %v896_v3  ;;  %v856_v23 = vunpack.c.h.bf16 %v927_v9  ;;  %v278_v26 = vadd.f32 %v976_v7, %v207_v16  ;;  %v208_v27 = vmul.f32 %v727_v17, %v962_v1 }
  0x56   :  { %v532_v24 = vmax.f32 %v468_v14, 0.0  ;;  %v469_v25 = vadd.f32 %v851_v6, %v277_v15  ;;  %595 = vst [vmem:[%s1482_s4 + $0x1a0] sm:$0xff] %v531_v20  ;;  %v731_v30 = vunpack.c.l.bf16 %v897_v18  ;;  %v859_v31 = vunpack.c.l.bf16 %v928_v19 }
  0x57   :  { %v209_v29 = vmul.f32 %v728_v22, %v962_v1  ;;  %v732_v32 = vunpack.c.h.bf16 %v897_v18  ;;  %v470_v35 = vadd.f32 %v852_v13, %v278_v26  ;;  %v279_v36 = vadd.f32 %v976_v7, %v208_v27 }
  0x58   :  { %596 = vst [vmem:[%s1482_s4 + $0x1a8] sm:$0xff] %v532_v24  ;;  %v533_v34 = vmax.f32 %v469_v25, 0.0  ;;  %v860_v37 = vunpack.c.h.bf16 %v928_v19  ;;  %v210_v39 = vmul.f32 %v731_v30, %v962_v1  ;;  %v735_v41 = vunpack.c.l.bf16 %v898_v28 }
  0x59   :  { %v280_v38 = vadd.f32 %v976_v7, %v209_v29  ;;  %v211_v40 = vmul.f32 %v732_v32, %v962_v1  ;;  %v534_v43 = vmax.f32 %v470_v35, 0.0  ;;  %v471_v44 = vadd.f32 %v855_v21, %v279_v36 }
  0x5a   :  { %597 = vst [vmem:[%s1482_s4 + $0x1b0] sm:$0xff] %v533_v34  ;;  %v863_v45 = vunpack.c.l.bf16 %v929_v33  ;;  %v736_v46 = vunpack.c.h.bf16 %v898_v28  ;;  %v281_v48 = vadd.f32 %v976_v7, %v210_v39  ;;  %v212_v50 = vmul.f32 %v735_v41, %v962_v1 }
  0x5b   :  { %v472_v47 = vadd.f32 %v856_v23, %v280_v38  ;;  %v282_v49 = vadd.f32 %v976_v7, %v211_v40  ;;  %598 = vst [vmem:[%s1482_s4 + $0x1b8] sm:$0xff] %v534_v43  ;;  %v535_v52 = vmax.f32 %v471_v44, 0.0  ;;  %v864_v54 = vunpack.c.h.bf16 %v929_v33 }
  0x5c   :  { %v213_v53 = vmul.f32 %v736_v46, %v962_v1  ;;  %v739_v55 = vunpack.c.l.bf16 %v899_v42  ;;  %v473_v57 = vadd.f32 %v859_v31, %v281_v48  ;;  %v283_v59 = vadd.f32 %v976_v7, %v212_v50 }
  0x5d   :  { %v536_v56 = vmax.f32 %v472_v47, 0.0  ;;  %v474_v58 = vadd.f32 %v860_v37, %v282_v49  ;;  %599 = vst [vmem:[%s1482_s4 + $0x1c0] sm:$0xff] %v535_v52  ;;  %v867_v62 = vunpack.c.l.bf16 %v930_v51  ;;  %v740_v63 = vunpack.c.h.bf16 %v899_v42 }
  0x5e   :  { %v284_v60 = vadd.f32 %v976_v7, %v213_v53  ;;  %v214_v61 = vmul.f32 %v739_v55, %v962_v1  ;;  %v537_v0 = vmax.f32 %v473_v57, 0.0  ;;  %v475_v3 = vadd.f32 %v863_v45, %v283_v59 }
  0x5f   :  { %600 = vst [vmem:[%s1482_s4 + $0x1c8] sm:$0xff] %v536_v56  ;;  %v538_v2 = vmax.f32 %v474_v58, 0.0  ;;  %v215_v6 = vmul.f32 %v740_v63, %v962_v1  ;;  %v868_v8 = vunpack.c.h.bf16 %v930_v51 }
  0x60   :  { %v476_v4 = vadd.f32 %v864_v54, %v284_v60  ;;  %v285_v5 = vadd.f32 %v976_v7, %v214_v61  ;;  %601 = vst [vmem:[%s1482_s4 + $0x1d0] sm:$0xff] %v537_v0  ;;  %v539_v9 = vmax.f32 %v475_v3, 0.0 }
  0x61   :  { %602 = vst [vmem:[%s1482_s4 + $0x1d8] sm:$0xff] %v538_v2  ;;  %v286_v12 = vadd.f32 %v976_v7, %v215_v6 }
  0x62   :  { %v540_v10 = vmax.f32 %v476_v4, 0.0  ;;  %v477_v11 = vadd.f32 %v867_v62, %v285_v5  ;;  %603 = vst [vmem:[%s1482_s4 + $0x1e0] sm:$0xff] %v539_v9 }
  0x63   :  { %v478_v13 = vadd.f32 %v868_v8, %v286_v12 }
  0x64   :  { %604 = vst [vmem:[%s1482_s4 + $0x1e8] sm:$0xff] %v540_v10  ;;  %v541_v1 = vmax.f32 %v477_v11, 0.0 }
  0x65   :  { %v542_v14 = vmax.f32 %v478_v13, 0.0 }
  0x66   :  { %605 = vst [vmem:[%s1482_s4 + $0x1f0] sm:$0xff] %v541_v1 }
  0x67   :  { %606 = vst [vmem:[%s1482_s4 + $0x1f8] sm:$0xff] %v542_v14 }

</bundles_post_ra>
